<compile_context>
chip_gen: v7x
topology: tpu7x:2x2x1
jax: 0.10.0
libtpu: 0.0.40
codegen_flags: <defaults>
</compile_context>

<pallas_src>
import functools

import jax
import jax.numpy as jnp
import numpy as np
from jax.experimental import pallas as pl
from jax.experimental.pallas import tpu as pltpu


# Contract dim 1 of lhs with dim 1 of rhs:  (M, K) x (O, K) -> (M, O)  (i.e. x @ W^T)
_TRANS_B = (((1,), (1,)), ((), ()))


# ----------------------------------------------------------------------------
# Tiled linear kernels (fallback path):  y = x @ W^T (+ b), W stored as (out, in).
# ----------------------------------------------------------------------------
def _linear_nobias_kernel(x_ref, w_ref, o_ref, acc_ref):
    @pl.when(pl.program_id(2) == 0)
    def _():
        acc_ref[...] = jnp.zeros_like(acc_ref)

    acc_ref[...] += jax.lax.dot_general(
        x_ref[...], w_ref[...], dimension_numbers=_TRANS_B,
        preferred_element_type=jnp.float32)

    @pl.when(pl.program_id(2) == pl.num_programs(2) - 1)
    def _():
        o_ref[...] = acc_ref[...].astype(o_ref.dtype)


def _linear_bias_kernel(x_ref, w_ref, b_ref, o_ref, acc_ref):
    @pl.when(pl.program_id(2) == 0)
    def _():
        acc_ref[...] = jnp.zeros_like(acc_ref)

    acc_ref[...] += jax.lax.dot_general(
        x_ref[...], w_ref[...], dimension_numbers=_TRANS_B,
        preferred_element_type=jnp.float32)

    @pl.when(pl.program_id(2) == pl.num_programs(2) - 1)
    def _():
        o_ref[...] = (acc_ref[...] + b_ref[...].astype(jnp.float32)).astype(o_ref.dtype)


def _pick_tile(dim, candidates):
    """Largest candidate that divides dim, else the full dim (small/demo shapes)."""
    for c in candidates:
        if dim % c == 0:
            return c
    return dim


def linear_pallas(x2d, weight, bias=None):
    """x2d: (M, K); weight: (out, K) [PyTorch layout]; bias: (out,) or None."""
    M, K = x2d.shape
    out_dim, K2 = weight.shape
    assert K == K2

    tm = _pick_tile(M, (256, 128, 64, 32, 16, 8))
    tn = _pick_tile(out_dim, (256, 128))          # lane dim: 128-multiple or full
    tk = _pick_tile(K, (512, 256, 128))           # lane dim: 128-multiple or full
    grid = (M // tm, out_dim // tn, K // tk)

    x_spec = pl.BlockSpec((tm, tk), lambda i, j, k: (i, k))
    w_spec = pl.BlockSpec((tn, tk), lambda i, j, k: (j, k))
    o_spec = pl.BlockSpec((tm, tn), lambda i, j, k: (i, j))
    scratch = [pltpu.VMEM((tm, tn), jnp.float32)]
    cparams = pltpu.CompilerParams(
        dimension_semantics=("parallel", "parallel", "arbitrary"))

    if bias is None:
        return pl.pallas_call(
            _linear_nobias_kernel,
            out_shape=jax.ShapeDtypeStruct((M, out_dim), x2d.dtype),
            grid=grid,
            in_specs=[x_spec, w_spec],
            out_specs=o_spec,
            scratch_shapes=scratch,
            compiler_params=cparams,
        )(x2d, weight)

    b2d = bias.reshape(1, out_dim)
    b_spec = pl.BlockSpec((1, tn), lambda i, j, k: (0, j))
    return pl.pallas_call(
        _linear_bias_kernel,
        out_shape=jax.ShapeDtypeStruct((M, out_dim), x2d.dtype),
        grid=grid,
        in_specs=[x_spec, w_spec, b_spec],
        out_specs=o_spec,
        scratch_shapes=scratch,
        compiler_params=cparams,
    )(x2d, weight, b2d)


# ----------------------------------------------------------------------------
# Shared per-head cosine-attention body.
#   qkv: (N, 3*H*d) f32 value already in vregs/VMEM.
#   Returns the (N, H*d) attention output (softmax divide deferred past PV).
# ----------------------------------------------------------------------------
def _cos_attn_heads(qkv, ls_ref, num_heads, head_dim):
    all_hd = num_heads * head_dim
    outs = []
    for h in range(num_heads):
        q = qkv[:, h * head_dim:(h + 1) * head_dim]
        k = qkv[:, all_hd + h * head_dim: all_hd + (h + 1) * head_dim]
        v = qkv[:, 2 * all_hd + h * head_dim: 2 * all_hd + (h + 1) * head_dim]

        ls = ls_ref[h]  # scalar from SMEM: exp(clamp(scale_h, max=4.6052))

        # F.normalize(..., dim=-1): x * 1/max(||x||, 1e-12); rsqrt -> EUP slot.
        q_inv = jax.lax.rsqrt(jnp.maximum(jnp.sum(q * q, axis=-1, keepdims=True), 1e-24))
        k_inv = jax.lax.rsqrt(jnp.maximum(jnp.sum(k * k, axis=-1, keepdims=True), 1e-24))
        qn = q * (q_inv * ls)   # logit_scale folded into (N, d) instead of (N, N)
        kn = k * k_inv

        s = jax.lax.dot_general(qn, kn, dimension_numbers=_TRANS_B,
                                preferred_element_type=jnp.float32)   # (N, N)

        # softmax with the divide deferred to after the PV matmul
        m = jnp.max(s, axis=-1, keepdims=True)
        p = jnp.exp(s - m)
        l = jnp.sum(p, axis=-1, keepdims=True)
        o_h = jnp.dot(p, v, preferred_element_type=jnp.float32)       # (N, d)
        outs.append(o_h * pl.reciprocal(l, approx=True))

    return jnp.concatenate(outs, axis=-1)                             # (N, H*d)


# ----------------------------------------------------------------------------
# Fully-fused kernel: qkv projection + attention + output projection per batch.
# Grid = (B,).  Weight blocks have constant index maps -> DMA'd once per core.
# ----------------------------------------------------------------------------
def _fused_cos_attn_kernel(ls_ref, x_ref, wqkv_ref, wproj_ref, b_ref, o_ref, *,
                           num_heads, head_dim):
    xb = x_ref[0].astype(jnp.float32)                                  # (N, C)

    qkv = jax.lax.dot_general(xb, wqkv_ref[...].astype(jnp.float32),
                              dimension_numbers=_TRANS_B,
                              preferred_element_type=jnp.float32)      # (N, 3*H*d)

    attn_out = _cos_attn_heads(qkv, ls_ref, num_heads, head_dim)       # (N, H*d)

    y = jax.lax.dot_general(attn_out, wproj_ref[...].astype(jnp.float32),
                            dimension_numbers=_TRANS_B,
                            preferred_element_type=jnp.float32)        # (N, C)
    y = y + b_ref[...].astype(jnp.float32)
    o_ref[0] = y.astype(o_ref.dtype)                                   # lane-dense store


def _fused_vmem_bytes(N, C, num_heads, head_dim):
    """Rough per-grid-step working-set estimate (f32 bytes) for the fused kernel."""
    hd = num_heads * head_dim
    io = 2 * N * C + 2 * N * C                 # x and y blocks, double-buffered
    w = 3 * hd * C + C * hd + C                # Wqkv, Wproj, bias
    tmp = N * 3 * hd + 2 * N * N + N * hd + N * C   # qkv, s/p, attn_out, y temporaries
    return 4 * (io + w + tmp)


_FUSED_VMEM_BUDGET = 24 * 1024 * 1024          # leave 2x headroom under the 48 MiB limit


def cos_attention_fused(x, params, num_heads, head_dim):
    B, N, C = x.shape
    all_hd = num_heads * head_dim

    logit_scale = jnp.exp(jnp.minimum(params["scale"].reshape(num_heads), 4.6052))
    logit_scale = logit_scale.astype(jnp.float32)
    bias2d = params["proj_bias"].reshape(1, C)

    kernel = functools.partial(_fused_cos_attn_kernel,
                               num_heads=num_heads, head_dim=head_dim)
    return pl.pallas_call(
        kernel,
        out_shape=jax.ShapeDtypeStruct((B, N, C), x.dtype),
        grid=(B,),
        in_specs=[
            pl.BlockSpec(memory_space=pltpu.MemorySpace.SMEM),        # logit_scale (H,)
            pl.BlockSpec((1, N, C), lambda b: (b, 0, 0)),             # x
            pl.BlockSpec((3 * all_hd, C), lambda b: (0, 0)),          # Wqkv (out, in)
            pl.BlockSpec((C, all_hd), lambda b: (0, 0)),              # Wproj (out, in)
            pl.BlockSpec((1, C), lambda b: (0, 0)),                   # proj bias
        ],
        out_specs=pl.BlockSpec((1, N, C), lambda b: (b, 0, 0)),
        compiler_params=pltpu.CompilerParams(
            dimension_semantics=("parallel",),
            vmem_limit_bytes=48 * 1024 * 1024),
    )(logit_scale, x, params["qkv_weight"], params["proj_weight"], bias2d)


# ----------------------------------------------------------------------------
# Attention-only kernel (fallback path for large per-batch working sets).
# Input qkv block: (1, N, 3*H*d); output block: (1, N, H*d).
# ----------------------------------------------------------------------------
def _cos_attn_kernel(ls_ref, qkv_ref, o_ref, *, num_heads, head_dim):
    qkv = qkv_ref[0].astype(jnp.float32)                               # (N, 3*H*d)
    o_ref[0] = _cos_attn_heads(qkv, ls_ref, num_heads, head_dim).astype(o_ref.dtype)


def cos_attention_core(qkv, logit_scale, num_heads, head_dim):
    """qkv: (B, N, 3*H*d); logit_scale: (H,).  Returns (B, N, H*d)."""
    B, N, three_hd = qkv.shape
    all_head_dim = num_heads * head_dim
    assert three_hd == 3 * all_head_dim

    kernel = functools.partial(_cos_attn_kernel,
                               num_heads=num_heads, head_dim=head_dim)
    return pl.pallas_call(
        kernel,
        out_shape=jax.ShapeDtypeStruct((B, N, all_head_dim), qkv.dtype),
        grid=(B,),
        in_specs=[
            pl.BlockSpec(memory_space=pltpu.MemorySpace.SMEM),        # logit_scale
            pl.BlockSpec((1, N, three_hd), lambda b: (b, 0, 0)),      # qkv
        ],
        out_specs=pl.BlockSpec((1, N, all_head_dim), lambda b: (b, 0, 0)),
        compiler_params=pltpu.CompilerParams(
            dimension_semantics=("parallel",),
            vmem_limit_bytes=48 * 1024 * 1024),
    )(logit_scale, qkv)


# ----------------------------------------------------------------------------
# Full CosAttention forward (attn_drop = proj_drop = 0.0 -> identity).
# ----------------------------------------------------------------------------
def cos_attention_forward(x, params, num_heads, force_unfused=False):
    B, N, C = x.shape
    all_head_dim = params["proj_weight"].shape[1]
    head_dim = all_head_dim // num_heads

    if (not force_unfused) and (
            _fused_vmem_bytes(N, C, num_heads, head_dim) <= _FUSED_VMEM_BUDGET):
        return cos_attention_fused(x, params, num_heads, head_dim)

    # Fallback: tiled projections + per-batch attention kernel.
    x2d = x.reshape(B * N, C)
    qkv = linear_pallas(x2d, params["qkv_weight"], None)               # (B*N, 3*H*d)
    qkv = qkv.reshape(B, N, 3 * all_head_dim)

    logit_scale = jnp.exp(jnp.minimum(params["scale"].reshape(num_heads), 4.6052))
    logit_scale = logit_scale.astype(jnp.float32)

    out = cos_attention_core(qkv, logit_scale, num_heads, head_dim)    # (B, N, H*d)
    y = linear_pallas(out.reshape(B * N, all_head_dim),
                      params["proj_weight"], params["proj_bias"])
    return y.reshape(B, N, C)


# Pure-JAX reference for sanity checking.
def cos_attention_ref(x, params, num_heads):
    B, N, C = x.shape
    all_head_dim = params["qkv_weight"].shape[0] // 3
    head_dim = all_head_dim // num_heads
    qkv = x @ params["qkv_weight"].T
    qkv = qkv.reshape(B, N, 3, num_heads, head_dim).transpose(2, 0, 3, 1, 4)
    q, k, v = qkv[0], qkv[1], qkv[2]
    qn = q / jnp.maximum(jnp.linalg.norm(q, axis=-1, keepdims=True), 1e-12)
    kn = k / jnp.maximum(jnp.linalg.norm(k, axis=-1, keepdims=True), 1e-12)
    attn = jnp.einsum("bhnd,bhmd->bhnm", qn, kn)
    logit_scale = jnp.exp(jnp.minimum(params["scale"], 4.6052))        # (H,1,1)
    attn = attn * logit_scale[None]
    attn = jax.nn.softmax(attn, axis=-1)
    out = jnp.einsum("bhnm,bhmd->bhnd", attn, v)
    out = out.transpose(0, 2, 1, 3).reshape(B, N, all_head_dim)
    return out @ params["proj_weight"].T + params["proj_bias"]


def init_params(key, dim, num_heads):
    head_dim = dim // num_heads
    all_head_dim = head_dim * num_heads
    k1, k2, k3 = jax.random.split(key, 3)
    return {
        # scale = log(10 * ones((H,1,1)))
        "scale": jnp.full((num_heads, 1, 1), float(np.log(10.0)), jnp.float32),
        "qkv_weight": jax.random.normal(k1, (3 * all_head_dim, dim), jnp.float32) * 0.02,
        "proj_weight": jax.random.normal(k2, (dim, all_head_dim), jnp.float32) * 0.02,
        "proj_bias": jax.random.normal(k3, (dim,), jnp.float32) * 0.01,
    }


if __name__ == "__main__":
    B, N, C = 2, 16, 64
    num_heads = 8

    key = jax.random.PRNGKey(0)
    kx, kp = jax.random.split(key)
    x = jax.random.normal(kx, (B, N, C), jnp.float32)
    params = init_params(kp, C, num_heads)

    ref = cos_attention_ref(x, params, num_heads)

    # Fused path (default for these shapes).
    fwd = jax.jit(functools.partial(cos_attention_forward, num_heads=num_heads))
    out = jax.block_until_ready(fwd(x, params))
    np.testing.assert_allclose(np.asarray(out), np.asarray(ref), rtol=1e-2, atol=1e-2)

    # Large-shape fallback path (tiled linears + attention-only kernel).
    fwd_unfused = jax.jit(functools.partial(cos_attention_forward,
                                            num_heads=num_heads, force_unfused=True))
    out2 = jax.block_until_ready(fwd_unfused(x, params))
    np.testing.assert_allclose(np.asarray(out2), np.asarray(ref), rtol=1e-2, atol=1e-2)

    print("KERNEL_OK")
</pallas_src>

<mosaic_0001>
module attributes {stable_mosaic.version = 11 : i64} {
  func.func @_fused_cos_attn_kernel(%arg0: i32, %arg1: memref<8xf32, #tpu.memory_space<smem>>, %arg2: memref<1x16x64xf32, #tpu.memory_space<vmem>>, %arg3: memref<192x64xf32, #tpu.memory_space<vmem>>, %arg4: memref<64x64xf32, #tpu.memory_space<vmem>>, %arg5: memref<1x64xf32, #tpu.memory_space<vmem>>, %arg6: memref<1x16x64xf32, #tpu.memory_space<vmem>>) attributes {dimension_semantics = [#tpu.dimension_semantics<parallel>], iteration_bounds = array<i64: 2>, scalar_prefetch = 0 : i64, scratch_operands = 0 : i64, tpu.core_type = #tpu.core_type<tc>, window_params = [{transform_indices = @transform_0, window_bounds = array<i64: 8>}, {transform_indices = @transform_1, window_bounds = array<i64: 1, 16, 64>}, {pipeline_mode = #tpu.pipeline_mode<synchronous>, transform_indices = @transform_2, window_bounds = array<i64: 192, 64>}, {pipeline_mode = #tpu.pipeline_mode<synchronous>, transform_indices = @transform_3, window_bounds = array<i64: 64, 64>}, {pipeline_mode = #tpu.pipeline_mode<synchronous>, transform_indices = @transform_4, window_bounds = array<i64: 1, 64>}, {transform_indices = @transform_5, window_bounds = array<i64: 1, 16, 64>}]} {
    %c0 = arith.constant 0 : index
    %c0_0 = arith.constant 0 : index
    %c0_1 = arith.constant 0 : index
    %0 = vector.load %arg2[%c0, %c0_0, %c0_1] : memref<1x16x64xf32, #tpu.memory_space<vmem>>, vector<1x16x64xf32>
    %1 = vector.shape_cast %0 : vector<1x16x64xf32> to vector<16x64xf32>
    %c0_2 = arith.constant 0 : index
    %c0_3 = arith.constant 0 : index
    %2 = vector.load %arg3[%c0_2, %c0_3] : memref<192x64xf32, #tpu.memory_space<vmem>>, vector<192x64xf32>
    %cst = arith.constant dense<0.000000e+00> : vector<16x192xf32>
    %3 = tpu.matmul %1, %2, %cst {dimension_numbers = #tpu.dot_dimension_numbers<[1], [1], [0], [0], [0, 0, 1, 0], [], []>} : vector<16x64xf32>, vector<192x64xf32>, vector<16x192xf32> -> vector<16x192xf32>
    %4 = vector.extract_strided_slice %3 {offsets = [0, 0], sizes = [16, 8], strides = [1, 1]} : vector<16x192xf32> to vector<16x8xf32>
    %5 = vector.extract_strided_slice %3 {offsets = [0, 64], sizes = [16, 8], strides = [1, 1]} : vector<16x192xf32> to vector<16x8xf32>
    %6 = vector.extract_strided_slice %3 {offsets = [0, 128], sizes = [16, 8], strides = [1, 1]} : vector<16x192xf32> to vector<16x8xf32>
    %c0_4 = arith.constant 0 : index
    %7 = memref.load %arg1[%c0_4] : memref<8xf32, #tpu.memory_space<smem>>
    %8 = arith.mulf %4, %4 : vector<16x8xf32>
    %cst_5 = arith.constant dense<0.000000e+00> : vector<16xf32>
    %9 = vector.multi_reduction <add>, %8, %cst_5 [1] : vector<16x8xf32> to vector<16xf32>
    %10 = vector.shape_cast %9 : vector<16xf32> to vector<16x1xf32>
    %cst_6 = arith.constant 1.000000e-24 : f32
    %11 = vector.broadcast %cst_6 : f32 to vector<16x1xf32>
    %12 = arith.maximumf %10, %11 : vector<16x1xf32>
    %13 = math.rsqrt %12 : vector<16x1xf32>
    %14 = arith.mulf %5, %5 : vector<16x8xf32>
    %cst_7 = arith.constant dense<0.000000e+00> : vector<16xf32>
    %15 = vector.multi_reduction <add>, %14, %cst_7 [1] : vector<16x8xf32> to vector<16xf32>
    %16 = vector.shape_cast %15 : vector<16xf32> to vector<16x1xf32>
    %cst_8 = arith.constant 1.000000e-24 : f32
    %17 = vector.broadcast %cst_8 : f32 to vector<16x1xf32>
    %18 = arith.maximumf %16, %17 : vector<16x1xf32>
    %19 = math.rsqrt %18 : vector<16x1xf32>
    %20 = vector.broadcast %7 : f32 to vector<16x1xf32>
    %21 = arith.mulf %13, %20 : vector<16x1xf32>
    %22 = vector.broadcast %21 : vector<16x1xf32> to vector<16x8xf32>
    %23 = arith.mulf %4, %22 : vector<16x8xf32>
    %24 = vector.broadcast %19 : vector<16x1xf32> to vector<16x8xf32>
    %25 = arith.mulf %5, %24 : vector<16x8xf32>
    %cst_9 = arith.constant dense<0.000000e+00> : vector<16x16xf32>
    %26 = tpu.matmul %23, %25, %cst_9 {dimension_numbers = #tpu.dot_dimension_numbers<[1], [1], [0], [0], [0, 0, 1, 0], [], []>} : vector<16x8xf32>, vector<16x8xf32>, vector<16x16xf32> -> vector<16x16xf32>
    %cst_10 = arith.constant dense<0xFF800000> : vector<16xf32>
    %27 = vector.multi_reduction <maximumf>, %26, %cst_10 [1] : vector<16x16xf32> to vector<16xf32>
    %28 = vector.shape_cast %27 : vector<16xf32> to vector<16x1xf32>
    %29 = vector.broadcast %28 : vector<16x1xf32> to vector<16x16xf32>
    %30 = arith.subf %26, %29 : vector<16x16xf32>
    %31 = math.exp %30 : vector<16x16xf32>
    %cst_11 = arith.constant dense<0.000000e+00> : vector<16xf32>
    %32 = vector.multi_reduction <add>, %31, %cst_11 [1] : vector<16x16xf32> to vector<16xf32>
    %33 = vector.shape_cast %32 : vector<16xf32> to vector<16x1xf32>
    %cst_12 = arith.constant dense<0.000000e+00> : vector<16x8xf32>
    %34 = tpu.matmul %31, %6, %cst_12 {dimension_numbers = #tpu.dot_dimension_numbers<[1], [0], [0], [1], [0, 0, 1, 1], [], []>} : vector<16x16xf32>, vector<16x8xf32>, vector<16x8xf32> -> vector<16x8xf32>
    %35 = tpu.reciprocal %33 {approx = true} : vector<16x1xf32> -> vector<16x1xf32>
    %36 = vector.broadcast %35 : vector<16x1xf32> to vector<16x8xf32>
    %37 = arith.mulf %34, %36 : vector<16x8xf32>
    %38 = vector.extract_strided_slice %3 {offsets = [0, 8], sizes = [16, 8], strides = [1, 1]} : vector<16x192xf32> to vector<16x8xf32>
    %39 = vector.extract_strided_slice %3 {offsets = [0, 72], sizes = [16, 8], strides = [1, 1]} : vector<16x192xf32> to vector<16x8xf32>
    %40 = vector.extract_strided_slice %3 {offsets = [0, 136], sizes = [16, 8], strides = [1, 1]} : vector<16x192xf32> to vector<16x8xf32>
    %c1 = arith.constant 1 : index
    %41 = memref.load %arg1[%c1] : memref<8xf32, #tpu.memory_space<smem>>
    %42 = arith.mulf %38, %38 : vector<16x8xf32>
    %cst_13 = arith.constant dense<0.000000e+00> : vector<16xf32>
    %43 = vector.multi_reduction <add>, %42, %cst_13 [1] : vector<16x8xf32> to vector<16xf32>
    %44 = vector.shape_cast %43 : vector<16xf32> to vector<16x1xf32>
    %cst_14 = arith.constant 1.000000e-24 : f32
    %45 = vector.broadcast %cst_14 : f32 to vector<16x1xf32>
    %46 = arith.maximumf %44, %45 : vector<16x1xf32>
    %47 = math.rsqrt %46 : vector<16x1xf32>
    %48 = arith.mulf %39, %39 : vector<16x8xf32>
    %cst_15 = arith.constant dense<0.000000e+00> : vector<16xf32>
    %49 = vector.multi_reduction <add>, %48, %cst_15 [1] : vector<16x8xf32> to vector<16xf32>
    %50 = vector.shape_cast %49 : vector<16xf32> to vector<16x1xf32>
    %cst_16 = arith.constant 1.000000e-24 : f32
    %51 = vector.broadcast %cst_16 : f32 to vector<16x1xf32>
    %52 = arith.maximumf %50, %51 : vector<16x1xf32>
    %53 = math.rsqrt %52 : vector<16x1xf32>
    %54 = vector.broadcast %41 : f32 to vector<16x1xf32>
    %55 = arith.mulf %47, %54 : vector<16x1xf32>
    %56 = vector.broadcast %55 : vector<16x1xf32> to vector<16x8xf32>
    %57 = arith.mulf %38, %56 : vector<16x8xf32>
    %58 = vector.broadcast %53 : vector<16x1xf32> to vector<16x8xf32>
    %59 = arith.mulf %39, %58 : vector<16x8xf32>
    %cst_17 = arith.constant dense<0.000000e+00> : vector<16x16xf32>
    %60 = tpu.matmul %57, %59, %cst_17 {dimension_numbers = #tpu.dot_dimension_numbers<[1], [1], [0], [0], [0, 0, 1, 0], [], []>} : vector<16x8xf32>, vector<16x8xf32>, vector<16x16xf32> -> vector<16x16xf32>
    %cst_18 = arith.constant dense<0xFF800000> : vector<16xf32>
    %61 = vector.multi_reduction <maximumf>, %60, %cst_18 [1] : vector<16x16xf32> to vector<16xf32>
    %62 = vector.shape_cast %61 : vector<16xf32> to vector<16x1xf32>
    %63 = vector.broadcast %62 : vector<16x1xf32> to vector<16x16xf32>
    %64 = arith.subf %60, %63 : vector<16x16xf32>
    %65 = math.exp %64 : vector<16x16xf32>
    %cst_19 = arith.constant dense<0.000000e+00> : vector<16xf32>
    %66 = vector.multi_reduction <add>, %65, %cst_19 [1] : vector<16x16xf32> to vector<16xf32>
    %67 = vector.shape_cast %66 : vector<16xf32> to vector<16x1xf32>
    %cst_20 = arith.constant dense<0.000000e+00> : vector<16x8xf32>
    %68 = tpu.matmul %65, %40, %cst_20 {dimension_numbers = #tpu.dot_dimension_numbers<[1], [0], [0], [1], [0, 0, 1, 1], [], []>} : vector<16x16xf32>, vector<16x8xf32>, vector<16x8xf32> -> vector<16x8xf32>
    %69 = tpu.reciprocal %67 {approx = true} : vector<16x1xf32> -> vector<16x1xf32>
    %70 = vector.broadcast %69 : vector<16x1xf32> to vector<16x8xf32>
    %71 = arith.mulf %68, %70 : vector<16x8xf32>
    %72 = vector.extract_strided_slice %3 {offsets = [0, 16], sizes = [16, 8], strides = [1, 1]} : vector<16x192xf32> to vector<16x8xf32>
    %73 = vector.extract_strided_slice %3 {offsets = [0, 80], sizes = [16, 8], strides = [1, 1]} : vector<16x192xf32> to vector<16x8xf32>
    %74 = vector.extract_strided_slice %3 {offsets = [0, 144], sizes = [16, 8], strides = [1, 1]} : vector<16x192xf32> to vector<16x8xf32>
    %c2 = arith.constant 2 : index
    %75 = memref.load %arg1[%c2] : memref<8xf32, #tpu.memory_space<smem>>
    %76 = arith.mulf %72, %72 : vector<16x8xf32>
    %cst_21 = arith.constant dense<0.000000e+00> : vector<16xf32>
    %77 = vector.multi_reduction <add>, %76, %cst_21 [1] : vector<16x8xf32> to vector<16xf32>
    %78 = vector.shape_cast %77 : vector<16xf32> to vector<16x1xf32>
    %cst_22 = arith.constant 1.000000e-24 : f32
    %79 = vector.broadcast %cst_22 : f32 to vector<16x1xf32>
    %80 = arith.maximumf %78, %79 : vector<16x1xf32>
    %81 = math.rsqrt %80 : vector<16x1xf32>
    %82 = arith.mulf %73, %73 : vector<16x8xf32>
    %cst_23 = arith.constant dense<0.000000e+00> : vector<16xf32>
    %83 = vector.multi_reduction <add>, %82, %cst_23 [1] : vector<16x8xf32> to vector<16xf32>
    %84 = vector.shape_cast %83 : vector<16xf32> to vector<16x1xf32>
    %cst_24 = arith.constant 1.000000e-24 : f32
    %85 = vector.broadcast %cst_24 : f32 to vector<16x1xf32>
    %86 = arith.maximumf %84, %85 : vector<16x1xf32>
    %87 = math.rsqrt %86 : vector<16x1xf32>
    %88 = vector.broadcast %75 : f32 to vector<16x1xf32>
    %89 = arith.mulf %81, %88 : vector<16x1xf32>
    %90 = vector.broadcast %89 : vector<16x1xf32> to vector<16x8xf32>
    %91 = arith.mulf %72, %90 : vector<16x8xf32>
    %92 = vector.broadcast %87 : vector<16x1xf32> to vector<16x8xf32>
    %93 = arith.mulf %73, %92 : vector<16x8xf32>
    %cst_25 = arith.constant dense<0.000000e+00> : vector<16x16xf32>
    %94 = tpu.matmul %91, %93, %cst_25 {dimension_numbers = #tpu.dot_dimension_numbers<[1], [1], [0], [0], [0, 0, 1, 0], [], []>} : vector<16x8xf32>, vector<16x8xf32>, vector<16x16xf32> -> vector<16x16xf32>
    %cst_26 = arith.constant dense<0xFF800000> : vector<16xf32>
    %95 = vector.multi_reduction <maximumf>, %94, %cst_26 [1] : vector<16x16xf32> to vector<16xf32>
    %96 = vector.shape_cast %95 : vector<16xf32> to vector<16x1xf32>
    %97 = vector.broadcast %96 : vector<16x1xf32> to vector<16x16xf32>
    %98 = arith.subf %94, %97 : vector<16x16xf32>
    %99 = math.exp %98 : vector<16x16xf32>
    %cst_27 = arith.constant dense<0.000000e+00> : vector<16xf32>
    %100 = vector.multi_reduction <add>, %99, %cst_27 [1] : vector<16x16xf32> to vector<16xf32>
    %101 = vector.shape_cast %100 : vector<16xf32> to vector<16x1xf32>
    %cst_28 = arith.constant dense<0.000000e+00> : vector<16x8xf32>
    %102 = tpu.matmul %99, %74, %cst_28 {dimension_numbers = #tpu.dot_dimension_numbers<[1], [0], [0], [1], [0, 0, 1, 1], [], []>} : vector<16x16xf32>, vector<16x8xf32>, vector<16x8xf32> -> vector<16x8xf32>
    %103 = tpu.reciprocal %101 {approx = true} : vector<16x1xf32> -> vector<16x1xf32>
    %104 = vector.broadcast %103 : vector<16x1xf32> to vector<16x8xf32>
    %105 = arith.mulf %102, %104 : vector<16x8xf32>
    %106 = vector.extract_strided_slice %3 {offsets = [0, 24], sizes = [16, 8], strides = [1, 1]} : vector<16x192xf32> to vector<16x8xf32>
    %107 = vector.extract_strided_slice %3 {offsets = [0, 88], sizes = [16, 8], strides = [1, 1]} : vector<16x192xf32> to vector<16x8xf32>
    %108 = vector.extract_strided_slice %3 {offsets = [0, 152], sizes = [16, 8], strides = [1, 1]} : vector<16x192xf32> to vector<16x8xf32>
    %c3 = arith.constant 3 : index
    %109 = memref.load %arg1[%c3] : memref<8xf32, #tpu.memory_space<smem>>
    %110 = arith.mulf %106, %106 : vector<16x8xf32>
    %cst_29 = arith.constant dense<0.000000e+00> : vector<16xf32>
    %111 = vector.multi_reduction <add>, %110, %cst_29 [1] : vector<16x8xf32> to vector<16xf32>
    %112 = vector.shape_cast %111 : vector<16xf32> to vector<16x1xf32>
    %cst_30 = arith.constant 1.000000e-24 : f32
    %113 = vector.broadcast %cst_30 : f32 to vector<16x1xf32>
    %114 = arith.maximumf %112, %113 : vector<16x1xf32>
    %115 = math.rsqrt %114 : vector<16x1xf32>
    %116 = arith.mulf %107, %107 : vector<16x8xf32>
    %cst_31 = arith.constant dense<0.000000e+00> : vector<16xf32>
    %117 = vector.multi_reduction <add>, %116, %cst_31 [1] : vector<16x8xf32> to vector<16xf32>
    %118 = vector.shape_cast %117 : vector<16xf32> to vector<16x1xf32>
    %cst_32 = arith.constant 1.000000e-24 : f32
    %119 = vector.broadcast %cst_32 : f32 to vector<16x1xf32>
    %120 = arith.maximumf %118, %119 : vector<16x1xf32>
    %121 = math.rsqrt %120 : vector<16x1xf32>
    %122 = vector.broadcast %109 : f32 to vector<16x1xf32>
    %123 = arith.mulf %115, %122 : vector<16x1xf32>
    %124 = vector.broadcast %123 : vector<16x1xf32> to vector<16x8xf32>
    %125 = arith.mulf %106, %124 : vector<16x8xf32>
    %126 = vector.broadcast %121 : vector<16x1xf32> to vector<16x8xf32>
    %127 = arith.mulf %107, %126 : vector<16x8xf32>
    %cst_33 = arith.constant dense<0.000000e+00> : vector<16x16xf32>
    %128 = tpu.matmul %125, %127, %cst_33 {dimension_numbers = #tpu.dot_dimension_numbers<[1], [1], [0], [0], [0, 0, 1, 0], [], []>} : vector<16x8xf32>, vector<16x8xf32>, vector<16x16xf32> -> vector<16x16xf32>
    %cst_34 = arith.constant dense<0xFF800000> : vector<16xf32>
    %129 = vector.multi_reduction <maximumf>, %128, %cst_34 [1] : vector<16x16xf32> to vector<16xf32>
    %130 = vector.shape_cast %129 : vector<16xf32> to vector<16x1xf32>
    %131 = vector.broadcast %130 : vector<16x1xf32> to vector<16x16xf32>
    %132 = arith.subf %128, %131 : vector<16x16xf32>
    %133 = math.exp %132 : vector<16x16xf32>
    %cst_35 = arith.constant dense<0.000000e+00> : vector<16xf32>
    %134 = vector.multi_reduction <add>, %133, %cst_35 [1] : vector<16x16xf32> to vector<16xf32>
    %135 = vector.shape_cast %134 : vector<16xf32> to vector<16x1xf32>
    %cst_36 = arith.constant dense<0.000000e+00> : vector<16x8xf32>
    %136 = tpu.matmul %133, %108, %cst_36 {dimension_numbers = #tpu.dot_dimension_numbers<[1], [0], [0], [1], [0, 0, 1, 1], [], []>} : vector<16x16xf32>, vector<16x8xf32>, vector<16x8xf32> -> vector<16x8xf32>
    %137 = tpu.reciprocal %135 {approx = true} : vector<16x1xf32> -> vector<16x1xf32>
    %138 = vector.broadcast %137 : vector<16x1xf32> to vector<16x8xf32>
    %139 = arith.mulf %136, %138 : vector<16x8xf32>
    %140 = vector.extract_strided_slice %3 {offsets = [0, 32], sizes = [16, 8], strides = [1, 1]} : vector<16x192xf32> to vector<16x8xf32>
    %141 = vector.extract_strided_slice %3 {offsets = [0, 96], sizes = [16, 8], strides = [1, 1]} : vector<16x192xf32> to vector<16x8xf32>
    %142 = vector.extract_strided_slice %3 {offsets = [0, 160], sizes = [16, 8], strides = [1, 1]} : vector<16x192xf32> to vector<16x8xf32>
    %c4 = arith.constant 4 : index
    %143 = memref.load %arg1[%c4] : memref<8xf32, #tpu.memory_space<smem>>
    %144 = arith.mulf %140, %140 : vector<16x8xf32>
    %cst_37 = arith.constant dense<0.000000e+00> : vector<16xf32>
    %145 = vector.multi_reduction <add>, %144, %cst_37 [1] : vector<16x8xf32> to vector<16xf32>
    %146 = vector.shape_cast %145 : vector<16xf32> to vector<16x1xf32>
    %cst_38 = arith.constant 1.000000e-24 : f32
    %147 = vector.broadcast %cst_38 : f32 to vector<16x1xf32>
    %148 = arith.maximumf %146, %147 : vector<16x1xf32>
    %149 = math.rsqrt %148 : vector<16x1xf32>
    %150 = arith.mulf %141, %141 : vector<16x8xf32>
    %cst_39 = arith.constant dense<0.000000e+00> : vector<16xf32>
    %151 = vector.multi_reduction <add>, %150, %cst_39 [1] : vector<16x8xf32> to vector<16xf32>
    %152 = vector.shape_cast %151 : vector<16xf32> to vector<16x1xf32>
    %cst_40 = arith.constant 1.000000e-24 : f32
    %153 = vector.broadcast %cst_40 : f32 to vector<16x1xf32>
    %154 = arith.maximumf %152, %153 : vector<16x1xf32>
    %155 = math.rsqrt %154 : vector<16x1xf32>
    %156 = vector.broadcast %143 : f32 to vector<16x1xf32>
    %157 = arith.mulf %149, %156 : vector<16x1xf32>
    %158 = vector.broadcast %157 : vector<16x1xf32> to vector<16x8xf32>
    %159 = arith.mulf %140, %158 : vector<16x8xf32>
    %160 = vector.broadcast %155 : vector<16x1xf32> to vector<16x8xf32>
    %161 = arith.mulf %141, %160 : vector<16x8xf32>
    %cst_41 = arith.constant dense<0.000000e+00> : vector<16x16xf32>
    %162 = tpu.matmul %159, %161, %cst_41 {dimension_numbers = #tpu.dot_dimension_numbers<[1], [1], [0], [0], [0, 0, 1, 0], [], []>} : vector<16x8xf32>, vector<16x8xf32>, vector<16x16xf32> -> vector<16x16xf32>
    %cst_42 = arith.constant dense<0xFF800000> : vector<16xf32>
    %163 = vector.multi_reduction <maximumf>, %162, %cst_42 [1] : vector<16x16xf32> to vector<16xf32>
    %164 = vector.shape_cast %163 : vector<16xf32> to vector<16x1xf32>
    %165 = vector.broadcast %164 : vector<16x1xf32> to vector<16x16xf32>
    %166 = arith.subf %162, %165 : vector<16x16xf32>
    %167 = math.exp %166 : vector<16x16xf32>
    %cst_43 = arith.constant dense<0.000000e+00> : vector<16xf32>
    %168 = vector.multi_reduction <add>, %167, %cst_43 [1] : vector<16x16xf32> to vector<16xf32>
    %169 = vector.shape_cast %168 : vector<16xf32> to vector<16x1xf32>
    %cst_44 = arith.constant dense<0.000000e+00> : vector<16x8xf32>
    %170 = tpu.matmul %167, %142, %cst_44 {dimension_numbers = #tpu.dot_dimension_numbers<[1], [0], [0], [1], [0, 0, 1, 1], [], []>} : vector<16x16xf32>, vector<16x8xf32>, vector<16x8xf32> -> vector<16x8xf32>
    %171 = tpu.reciprocal %169 {approx = true} : vector<16x1xf32> -> vector<16x1xf32>
    %172 = vector.broadcast %171 : vector<16x1xf32> to vector<16x8xf32>
    %173 = arith.mulf %170, %172 : vector<16x8xf32>
    %174 = vector.extract_strided_slice %3 {offsets = [0, 40], sizes = [16, 8], strides = [1, 1]} : vector<16x192xf32> to vector<16x8xf32>
    %175 = vector.extract_strided_slice %3 {offsets = [0, 104], sizes = [16, 8], strides = [1, 1]} : vector<16x192xf32> to vector<16x8xf32>
    %176 = vector.extract_strided_slice %3 {offsets = [0, 168], sizes = [16, 8], strides = [1, 1]} : vector<16x192xf32> to vector<16x8xf32>
    %c5 = arith.constant 5 : index
    %177 = memref.load %arg1[%c5] : memref<8xf32, #tpu.memory_space<smem>>
    %178 = arith.mulf %174, %174 : vector<16x8xf32>
    %cst_45 = arith.constant dense<0.000000e+00> : vector<16xf32>
    %179 = vector.multi_reduction <add>, %178, %cst_45 [1] : vector<16x8xf32> to vector<16xf32>
    %180 = vector.shape_cast %179 : vector<16xf32> to vector<16x1xf32>
    %cst_46 = arith.constant 1.000000e-24 : f32
    %181 = vector.broadcast %cst_46 : f32 to vector<16x1xf32>
    %182 = arith.maximumf %180, %181 : vector<16x1xf32>
    %183 = math.rsqrt %182 : vector<16x1xf32>
    %184 = arith.mulf %175, %175 : vector<16x8xf32>
    %cst_47 = arith.constant dense<0.000000e+00> : vector<16xf32>
    %185 = vector.multi_reduction <add>, %184, %cst_47 [1] : vector<16x8xf32> to vector<16xf32>
    %186 = vector.shape_cast %185 : vector<16xf32> to vector<16x1xf32>
    %cst_48 = arith.constant 1.000000e-24 : f32
    %187 = vector.broadcast %cst_48 : f32 to vector<16x1xf32>
    %188 = arith.maximumf %186, %187 : vector<16x1xf32>
    %189 = math.rsqrt %188 : vector<16x1xf32>
    %190 = vector.broadcast %177 : f32 to vector<16x1xf32>
    %191 = arith.mulf %183, %190 : vector<16x1xf32>
    %192 = vector.broadcast %191 : vector<16x1xf32> to vector<16x8xf32>
    %193 = arith.mulf %174, %192 : vector<16x8xf32>
    %194 = vector.broadcast %189 : vector<16x1xf32> to vector<16x8xf32>
    %195 = arith.mulf %175, %194 : vector<16x8xf32>
    %cst_49 = arith.constant dense<0.000000e+00> : vector<16x16xf32>
    %196 = tpu.matmul %193, %195, %cst_49 {dimension_numbers = #tpu.dot_dimension_numbers<[1], [1], [0], [0], [0, 0, 1, 0], [], []>} : vector<16x8xf32>, vector<16x8xf32>, vector<16x16xf32> -> vector<16x16xf32>
    %cst_50 = arith.constant dense<0xFF800000> : vector<16xf32>
    %197 = vector.multi_reduction <maximumf>, %196, %cst_50 [1] : vector<16x16xf32> to vector<16xf32>
    %198 = vector.shape_cast %197 : vector<16xf32> to vector<16x1xf32>
    %199 = vector.broadcast %198 : vector<16x1xf32> to vector<16x16xf32>
    %200 = arith.subf %196, %199 : vector<16x16xf32>
    %201 = math.exp %200 : vector<16x16xf32>
    %cst_51 = arith.constant dense<0.000000e+00> : vector<16xf32>
    %202 = vector.multi_reduction <add>, %201, %cst_51 [1] : vector<16x16xf32> to vector<16xf32>
    %203 = vector.shape_cast %202 : vector<16xf32> to vector<16x1xf32>
    %cst_52 = arith.constant dense<0.000000e+00> : vector<16x8xf32>
    %204 = tpu.matmul %201, %176, %cst_52 {dimension_numbers = #tpu.dot_dimension_numbers<[1], [0], [0], [1], [0, 0, 1, 1], [], []>} : vector<16x16xf32>, vector<16x8xf32>, vector<16x8xf32> -> vector<16x8xf32>
    %205 = tpu.reciprocal %203 {approx = true} : vector<16x1xf32> -> vector<16x1xf32>
    %206 = vector.broadcast %205 : vector<16x1xf32> to vector<16x8xf32>
    %207 = arith.mulf %204, %206 : vector<16x8xf32>
    %208 = vector.extract_strided_slice %3 {offsets = [0, 48], sizes = [16, 8], strides = [1, 1]} : vector<16x192xf32> to vector<16x8xf32>
    %209 = vector.extract_strided_slice %3 {offsets = [0, 112], sizes = [16, 8], strides = [1, 1]} : vector<16x192xf32> to vector<16x8xf32>
    %210 = vector.extract_strided_slice %3 {offsets = [0, 176], sizes = [16, 8], strides = [1, 1]} : vector<16x192xf32> to vector<16x8xf32>
    %c6 = arith.constant 6 : index
    %211 = memref.load %arg1[%c6] : memref<8xf32, #tpu.memory_space<smem>>
    %212 = arith.mulf %208, %208 : vector<16x8xf32>
    %cst_53 = arith.constant dense<0.000000e+00> : vector<16xf32>
    %213 = vector.multi_reduction <add>, %212, %cst_53 [1] : vector<16x8xf32> to vector<16xf32>
    %214 = vector.shape_cast %213 : vector<16xf32> to vector<16x1xf32>
    %cst_54 = arith.constant 1.000000e-24 : f32
    %215 = vector.broadcast %cst_54 : f32 to vector<16x1xf32>
    %216 = arith.maximumf %214, %215 : vector<16x1xf32>
    %217 = math.rsqrt %216 : vector<16x1xf32>
    %218 = arith.mulf %209, %209 : vector<16x8xf32>
    %cst_55 = arith.constant dense<0.000000e+00> : vector<16xf32>
    %219 = vector.multi_reduction <add>, %218, %cst_55 [1] : vector<16x8xf32> to vector<16xf32>
    %220 = vector.shape_cast %219 : vector<16xf32> to vector<16x1xf32>
    %cst_56 = arith.constant 1.000000e-24 : f32
    %221 = vector.broadcast %cst_56 : f32 to vector<16x1xf32>
    %222 = arith.maximumf %220, %221 : vector<16x1xf32>
    %223 = math.rsqrt %222 : vector<16x1xf32>
    %224 = vector.broadcast %211 : f32 to vector<16x1xf32>
    %225 = arith.mulf %217, %224 : vector<16x1xf32>
    %226 = vector.broadcast %225 : vector<16x1xf32> to vector<16x8xf32>
    %227 = arith.mulf %208, %226 : vector<16x8xf32>
    %228 = vector.broadcast %223 : vector<16x1xf32> to vector<16x8xf32>
    %229 = arith.mulf %209, %228 : vector<16x8xf32>
    %cst_57 = arith.constant dense<0.000000e+00> : vector<16x16xf32>
    %230 = tpu.matmul %227, %229, %cst_57 {dimension_numbers = #tpu.dot_dimension_numbers<[1], [1], [0], [0], [0, 0, 1, 0], [], []>} : vector<16x8xf32>, vector<16x8xf32>, vector<16x16xf32> -> vector<16x16xf32>
    %cst_58 = arith.constant dense<0xFF800000> : vector<16xf32>
    %231 = vector.multi_reduction <maximumf>, %230, %cst_58 [1] : vector<16x16xf32> to vector<16xf32>
    %232 = vector.shape_cast %231 : vector<16xf32> to vector<16x1xf32>
    %233 = vector.broadcast %232 : vector<16x1xf32> to vector<16x16xf32>
    %234 = arith.subf %230, %233 : vector<16x16xf32>
    %235 = math.exp %234 : vector<16x16xf32>
    %cst_59 = arith.constant dense<0.000000e+00> : vector<16xf32>
    %236 = vector.multi_reduction <add>, %235, %cst_59 [1] : vector<16x16xf32> to vector<16xf32>
    %237 = vector.shape_cast %236 : vector<16xf32> to vector<16x1xf32>
    %cst_60 = arith.constant dense<0.000000e+00> : vector<16x8xf32>
    %238 = tpu.matmul %235, %210, %cst_60 {dimension_numbers = #tpu.dot_dimension_numbers<[1], [0], [0], [1], [0, 0, 1, 1], [], []>} : vector<16x16xf32>, vector<16x8xf32>, vector<16x8xf32> -> vector<16x8xf32>
    %239 = tpu.reciprocal %237 {approx = true} : vector<16x1xf32> -> vector<16x1xf32>
    %240 = vector.broadcast %239 : vector<16x1xf32> to vector<16x8xf32>
    %241 = arith.mulf %238, %240 : vector<16x8xf32>
    %242 = vector.extract_strided_slice %3 {offsets = [0, 56], sizes = [16, 8], strides = [1, 1]} : vector<16x192xf32> to vector<16x8xf32>
    %243 = vector.extract_strided_slice %3 {offsets = [0, 120], sizes = [16, 8], strides = [1, 1]} : vector<16x192xf32> to vector<16x8xf32>
    %244 = vector.extract_strided_slice %3 {offsets = [0, 184], sizes = [16, 8], strides = [1, 1]} : vector<16x192xf32> to vector<16x8xf32>
    %c7 = arith.constant 7 : index
    %245 = memref.load %arg1[%c7] : memref<8xf32, #tpu.memory_space<smem>>
    %246 = arith.mulf %242, %242 : vector<16x8xf32>
    %cst_61 = arith.constant dense<0.000000e+00> : vector<16xf32>
    %247 = vector.multi_reduction <add>, %246, %cst_61 [1] : vector<16x8xf32> to vector<16xf32>
    %248 = vector.shape_cast %247 : vector<16xf32> to vector<16x1xf32>
    %cst_62 = arith.constant 1.000000e-24 : f32
    %249 = vector.broadcast %cst_62 : f32 to vector<16x1xf32>
    %250 = arith.maximumf %248, %249 : vector<16x1xf32>
    %251 = math.rsqrt %250 : vector<16x1xf32>
    %252 = arith.mulf %243, %243 : vector<16x8xf32>
    %cst_63 = arith.constant dense<0.000000e+00> : vector<16xf32>
    %253 = vector.multi_reduction <add>, %252, %cst_63 [1] : vector<16x8xf32> to vector<16xf32>
    %254 = vector.shape_cast %253 : vector<16xf32> to vector<16x1xf32>
    %cst_64 = arith.constant 1.000000e-24 : f32
    %255 = vector.broadcast %cst_64 : f32 to vector<16x1xf32>
    %256 = arith.maximumf %254, %255 : vector<16x1xf32>
    %257 = math.rsqrt %256 : vector<16x1xf32>
    %258 = vector.broadcast %245 : f32 to vector<16x1xf32>
    %259 = arith.mulf %251, %258 : vector<16x1xf32>
    %260 = vector.broadcast %259 : vector<16x1xf32> to vector<16x8xf32>
    %261 = arith.mulf %242, %260 : vector<16x8xf32>
    %262 = vector.broadcast %257 : vector<16x1xf32> to vector<16x8xf32>
    %263 = arith.mulf %243, %262 : vector<16x8xf32>
    %cst_65 = arith.constant dense<0.000000e+00> : vector<16x16xf32>
    %264 = tpu.matmul %261, %263, %cst_65 {dimension_numbers = #tpu.dot_dimension_numbers<[1], [1], [0], [0], [0, 0, 1, 0], [], []>} : vector<16x8xf32>, vector<16x8xf32>, vector<16x16xf32> -> vector<16x16xf32>
    %cst_66 = arith.constant dense<0xFF800000> : vector<16xf32>
    %265 = vector.multi_reduction <maximumf>, %264, %cst_66 [1] : vector<16x16xf32> to vector<16xf32>
    %266 = vector.shape_cast %265 : vector<16xf32> to vector<16x1xf32>
    %267 = vector.broadcast %266 : vector<16x1xf32> to vector<16x16xf32>
    %268 = arith.subf %264, %267 : vector<16x16xf32>
    %269 = math.exp %268 : vector<16x16xf32>
    %cst_67 = arith.constant dense<0.000000e+00> : vector<16xf32>
    %270 = vector.multi_reduction <add>, %269, %cst_67 [1] : vector<16x16xf32> to vector<16xf32>
    %271 = vector.shape_cast %270 : vector<16xf32> to vector<16x1xf32>
    %cst_68 = arith.constant dense<0.000000e+00> : vector<16x8xf32>
    %272 = tpu.matmul %269, %244, %cst_68 {dimension_numbers = #tpu.dot_dimension_numbers<[1], [0], [0], [1], [0, 0, 1, 1], [], []>} : vector<16x16xf32>, vector<16x8xf32>, vector<16x8xf32> -> vector<16x8xf32>
    %273 = tpu.reciprocal %271 {approx = true} : vector<16x1xf32> -> vector<16x1xf32>
    %274 = vector.broadcast %273 : vector<16x1xf32> to vector<16x8xf32>
    %275 = arith.mulf %272, %274 : vector<16x8xf32>
    %276 = tpu.concatenate %37, %71, %105, %139, %173, %207, %241, %275 in 1 : vector<16x8xf32>, vector<16x8xf32>, vector<16x8xf32>, vector<16x8xf32>, vector<16x8xf32>, vector<16x8xf32>, vector<16x8xf32>, vector<16x8xf32> -> vector<16x64xf32>
    %c0_69 = arith.constant 0 : index
    %c0_70 = arith.constant 0 : index
    %277 = vector.load %arg4[%c0_69, %c0_70] : memref<64x64xf32, #tpu.memory_space<vmem>>, vector<64x64xf32>
    %cst_71 = arith.constant dense<0.000000e+00> : vector<16x64xf32>
    %278 = tpu.matmul %276, %277, %cst_71 {dimension_numbers = #tpu.dot_dimension_numbers<[1], [1], [0], [0], [0, 0, 1, 0], [], []>} : vector<16x64xf32>, vector<64x64xf32>, vector<16x64xf32> -> vector<16x64xf32>
    %c0_72 = arith.constant 0 : index
    %c0_73 = arith.constant 0 : index
    %279 = vector.load %arg5[%c0_72, %c0_73] : memref<1x64xf32, #tpu.memory_space<vmem>>, vector<1x64xf32>
    %280 = vector.broadcast %279 : vector<1x64xf32> to vector<16x64xf32>
    %281 = arith.addf %278, %280 : vector<16x64xf32>
    %c0_74 = arith.constant 0 : index
    %c0_75 = arith.constant 0 : index
    %c0_76 = arith.constant 0 : index
    %282 = vector.load %arg6[%c0_74, %c0_75, %c0_76] : memref<1x16x64xf32, #tpu.memory_space<vmem>>, vector<1x16x64xf32>
    %283 = vector.shape_cast %282 : vector<1x16x64xf32> to vector<16x64xf32>
    %284 = vector.shape_cast %281 : vector<16x64xf32> to vector<1x16x64xf32>
    tpu.vector_store %arg6[%c0_74, %c0_75, %c0_76], %284 {strides = array<i32>} : memref<1x16x64xf32, #tpu.memory_space<vmem>>, vector<1x16x64xf32>,
    return
  }
  func.func @transform_0(%arg0: i32) -> i32 {
    %c0_i32 = arith.constant 0 : i32
    %c0_i32_0 = arith.constant 0 : i32
    return %c0_i32 : i32
  }
  func.func @transform_1(%arg0: i32) -> (i32, i32, i32) {
    %c0_i32 = arith.constant 0 : i32
    %c0_i32_0 = arith.constant 0 : i32
    %c0_i32_1 = arith.constant 0 : i32
    return %arg0, %c0_i32, %c0_i32_0 : i32, i32, i32
  }
  func.func @transform_2(%arg0: i32) -> (i32, i32) {
    %c0_i32 = arith.constant 0 : i32
    %c0_i32_0 = arith.constant 0 : i32
    %c0_i32_1 = arith.constant 0 : i32
    return %c0_i32, %c0_i32_0 : i32, i32
  }
  func.func @transform_3(%arg0: i32) -> (i32, i32) {
    %c0_i32 = arith.constant 0 : i32
    %c0_i32_0 = arith.constant 0 : i32
    %c0_i32_1 = arith.constant 0 : i32
    return %c0_i32, %c0_i32_0 : i32, i32
  }
  func.func @transform_4(%arg0: i32) -> (i32, i32) {
    %c0_i32 = arith.constant 0 : i32
    %c0_i32_0 = arith.constant 0 : i32
    %c0_i32_1 = arith.constant 0 : i32
    return %c0_i32, %c0_i32_0 : i32, i32
  }
  func.func @transform_5(%arg0: i32) -> (i32, i32, i32) {
    %c0_i32 = arith.constant 0 : i32
    %c0_i32_0 = arith.constant 0 : i32
    %c0_i32_1 = arith.constant 0 : i32
    return %arg0, %c0_i32, %c0_i32_0 : i32, i32, i32
  }
}

</mosaic_0001>

<bundles_post_ra>
// kernel: cos_attention_forward.1
= control target key start
LH: loop header
LB: loop body
LE: loop exit
PB: predicated region body
PF: predicated region fallthrough
CT: control target
= control target key end

     0   :  { %10 = vsyncpa [#allocation4], 0  ;;  %s4191_s0 = inlined_call_operand.vmem [shape: f32[8], index: 0, kind: input, shape index: {}]   ;;  %s4192_s1 = inlined_call_operand.vmem [shape: f32[2,16,64], index: 1, kind: input, shape index: {}]   ;;  %s4193_s2 = inlined_call_operand.vmem [shape: f32[192,64], index: 2, kind: input, shape index: {}]   ;;  %s4194_s3 = inlined_call_operand.vmem [shape: f32[64,64], index: 3, kind: input, shape index: {}]   ;;  %s4195_s4 = inlined_call_operand.vmem [shape: f32[1,64], index: 4, kind: input, shape index: {}]   ;;  %s4196_s5 = inlined_call_operand.hbm [shape: f32[2,16,64], index: 5, kind: output, shape index: {}]  }
   0x1   :  { %11 = vsyncpa [#allocation3], 0 }
   0x2   :  { %13 = vsyncpa [#allocation3 + $0x1], 0  ;;  %s3517_s18 = smov 0   ;;  %s3519_s19 = smov 0  }
   0x3   :  { %s3521_s20 = smov 0   ;;  %s3523_s21 = smov 0  }
   0x4 LB: > { %s3538_s22 = sadd.s32 4294967295, %s3465_s21   ;;  %s2648_s23 = sadd.s32 4294967294, %s3465_s21   ;;  %s3465_s21 = sphi %s3523_s21, %s4207_s21   ;;  %s3461_s20 = sphi %s3521_s20, %s4206_s20   ;;  %s3457_s19 = sphi %s3519_s19, %s4205_s19   ;;  %s3453_s18 = sphi %s3517_s18, %s4204_s18  }
   0x5   : > { %s3542_s24 = sadd.s32 1, %s3465_s21   ;;  %s136_s25 = sadd.s32 1, %s3461_s20 }
   0x6   : > { %s133_s26 = ssub.s32 %s3465_s21, %s3542_s24  ;;  %p146_p0 = scmp.ne.s32.totalorder %s3461_s20, %s3457_s19 }
   0x7   : > { %p134_p1 = scmp.eq.s32.totalorder %s133_s26, 0  ;;  %p147_p2 = scmp.eq.s32.totalorder %s3538_s22, 1 }
   0x8   : > { %p152_p3 = scmp.ne.s32.totalorder %s3457_s19, %s3453_s18  ;;  %p153_p4 = scmp.eq.s32.totalorder %s2648_s23, 1 }
   0x9   : > { %s3553_s27 = scalar_select %p134_p1, %s3461_s20, %s136_s25  }
   0xa   : > { %p3555_p5 = por %p147_p2, %p146_p0  ;;  %p3559_p6 = por %p153_p4, %p152_p3 }
   0xb   : > { %p2649_p7 = scmp.ge.s32.totalorder %s3465_s21, 1  ;;  %p160_p8 = scmp.lt.s32.totalorder %s3465_s21, 3 }
   0xc   : > { %p3127_p9 = scmp.eq.s32.totalorder %s3538_s22, 0  ;;  %s173_s8 = sshll.u32 %s4191_s0, 4  ;;  %s174_s8 = int_to_ptr.vmem [resolvable:$true] %s173_s8 }
   0xd   : > { %p3566_p10 = pnand %p2649_p7, %p160_p8  ;;  %s3384_s9 = scalar_lea.vmem %s174_s8, 16 }
   0xe   : > { %p3385_p13 = scmp.ne.s32.totalorder %s174_s8, %s3384_s9  ;;  %p3392_p3 = scmp.lt.s32.totalorder %s174_s8, %s174_s8 }
   0xf   : > { %p3119_p11 = pneg %p3566_p10  ;;  %p3393_p4 = scmp.lt.s32.totalorder %s3384_s9, %s3384_s9 }
  0x11   : > { %p3120_p12 = pnand %p3127_p9, %p3119_p11  ;;  %p3394_p7 = por %p3393_p4, %p3392_p3 }
  0x13   : > { %p3386_p0 = pneg %p3120_p12 }
  0x15   : > { %p3387_p1 = pnand %p3386_p0, %p3385_p13 }
  0x17   : > { %p3388_p2 = pneg %p3387_p1 }
  0x19   : > { %p3395_p8 = pnand %p3394_p7, %p3388_p2 }
  0x1b   : > { %3398 = shalt.err (!%p3395_p8)
}
  0x1c   : > { %s3467_s10 = smov [#allocation2]   ;;  %203 = sbr.rel (%p3566_p10) target bundleno = 4353 (0x1101), region = 40 }
  0x1d   : > { %3122 = dma.vmem_to_smem (!%p3120_p12), %s174_s8, 16, %s3467_s10, [#allocation4]  }
  0x23   : > { %3444 = dma.done.wait (%p3127_p9), [#allocation4], 16  }
  0x24   : > { %3446 = vsyncadd (%p3127_p9), [#allocation4], 4294967280 }
  0x25   : > { %209 = sfence }
  0x26   : > { %v239_v0 = vld [vmem:[%s4193_s2] sm:$0xff]  ;;  %v240_v1 = vld [vmem:[%s4193_s2 + $0x8] sm:$0xff]  ;;  %vm263_vm0 = vcmask 523264   ;;  %v3468_v2 = vmov 0.0|0.0   ;;  %v3469_v5 = vmov 0.0   ;;  %v241_v6 = vld [vmem:[%s4193_s2 + $0x10] sm:$0xff] }
  0x27   : > { %2961 = vmatprep.subr.bf16.mxu0 %v3468_v2  ;;  %v2962_v3 = vpack.c.bf16 %v240_v1, %v239_v0  ;;  %vm3591_vm1 = vmpackc.low %vm263_vm0, %vm263_vm0  ;;  %406 = vmatprep.mubr.f32.mxu0 %v3469_v5  ;;  %v242_v7 = vld [vmem:[%s4193_s2 + $0x18] sm:$0xff]  ;;  %v243_v9 = vld [vmem:[%s4193_s2 + $0x20] sm:$0xff]  ;;  %p232_p9 = scmp.lt.s32.totalorder %s3538_s22, 1  ;;  %s3470_s16 = smov 64   ;;  %vm422_vm2 = vcmask 64512   ;;  %vm549_vm4 = vcmask 130048  }
  0x28   : > { %v2966_v8 = vpack.c.bf16 %v242_v7, %v241_v6  ;;  %v244_v10 = vld [vmem:[%s4193_s2 + $0x28] sm:$0xff]  ;;  %v245_v12 = vld [vmem:[%s4193_s2 + $0x30] sm:$0xff]  ;;  %v246_v13 = vld [vmem:[%s4193_s2 + $0x38] sm:$0xff]  ;;  %s3471_s17 = smov 120   ;;  %s3722_s23 = sld [smem:[#allocation2]]  ;;  %vm2423_vm5 = vcmask 195584  }
  0x29   : > { %2964 = vmatpush1.bf16.xpose.msk.msra.mxu0 %vm3591_vm1, %v2962_v3  ;;  %v2970_v11 = vpack.c.bf16 %v244_v10, %v243_v9  ;;  %v2974_v14 = vpack.c.bf16 %v246_v13, %v245_v12  ;;  %v247_v15 = vld [vmem:[%s4193_s2 + $0x40] sm:$0xff]  ;;  %v248_v16 = vld [vmem:[%s4193_s2 + $0x48] sm:$0xff]  ;;  %v249_v18 = vld [vmem:[%s4193_s2 + $0x50] sm:$0xff]  ;;  %s233_s11 = scalar_select %p232_p9, %s3538_s22, 1  ;;  %vm2426_vm6 = vcmask 261120   ;;  %vm2429_vm7 = vcmask 326656  }
  0x2a   : > { %2965 = vmatprep.subr.bf16.mxu0 %v3468_v2  ;;  %v2978_v17 = vpack.c.bf16 %v248_v16, %v247_v15  ;;  %v250_v19 = vld [vmem:[%s4193_s2 + $0x58] sm:$0xff]  ;;  %v251_v21 = vld [vmem:[%s4193_s2 + $0x60] sm:$0xff]  ;;  %v252_v22 = vld [vmem:[%s4193_s2 + $0x68] sm:$0xff]  ;;  %s3472_s25 = smov 56   ;;  %s3473_s26 = smov 48   ;;  %vm2432_vm8 = vcmask 392192  }
  0x2b   : > { %v2982_v20 = vpack.c.bf16 %v250_v19, %v249_v18  ;;  %v2986_v23 = vpack.c.bf16 %v252_v22, %v251_v21  ;;  %v253_v24 = vld [vmem:[%s4193_s2 + $0x70] sm:$0xff]  ;;  %v254_v25 = vld [vmem:[%s4193_s2 + $0x78] sm:$0xff]  ;;  %v255_v27 = vld [vmem:[%s4193_s2 + $0x80] sm:$0xff]  ;;  %s2754_s12 = sshll.u32 %s233_s11, 4  ;;  %s3474_s30 = smov 112   ;;  %vm2435_vm9 = vcmask 457728  }
  0x2c   : > { %v2990_v26 = vpack.c.bf16 %v254_v25, %v253_v24  ;;  %v256_v28 = vld [vmem:[%s4193_s2 + $0x88] sm:$0xff]  ;;  %v257_v30 = vld [vmem:[%s4193_s2 + $0x90] sm:$0xff]  ;;  %v258_v31 = vld [vmem:[%s4193_s2 + $0x98] sm:$0xff]  ;;  %s236_s15 = scalar_lea.vmem %s4192_s1, %s2754_s12  ;;  %s2689_s6 = sld [smem:[#allocation2 + $0x1]] }
  0x2d   : > { %v2994_v29 = vpack.c.bf16 %v256_v28, %v255_v27  ;;  %v2998_v32 = vpack.c.bf16 %v258_v31, %v257_v30  ;;  %v259_v33 = vld [vmem:[%s4193_s2 + $0xa0] sm:$0xff]  ;;  %v260_v34 = vld [vmem:[%s4193_s2 + $0xa8] sm:$0xff]  ;;  %v261_v36 = vld [vmem:[%s4193_s2 + $0xb0] sm:$0xff]  ;;  %s2696_s7 = sld [smem:[#allocation2 + $0x2]]  ;;  %s3475_s8 = smov 40  }
  0x2e   : > { %v3002_v35 = vpack.c.bf16 %v260_v34, %v259_v33  ;;  %v262_v37 = vld [vmem:[%s4193_s2 + $0xb8] sm:$0xff]  ;;  %v237_v39 = vld [vmem:[%s236_s15] sm:$0xff]  ;;  %v238_v40 = vld [vmem:[%s236_s15 + $0x8] sm:$0xff]  ;;  %v451_v57 = vstv %s3722_s23  ;;  %s3476_s9 = smov 104   ;;  %s2703_s10 = sld [smem:[#allocation2 + $0x3]] }
  0x2f   : > { %v3006_v38 = vpack.c.bf16 %v262_v37, %v261_v36  ;;  %vm3738_vm3 = vmpackc.low %vm422_vm2, %vm422_vm2  ;;  %s3477_s11 = smov 32   ;;  %s3478_s12 = smov 96  }
  0x30   : > { %s2710_s13 = sld [smem:[#allocation2 + $0x4]]  ;;  %s3479_s14 = smov 24  }
  0x31   : > { %2968 = vmatpush1.bf16.xpose.msk.msra.mxu0 %vm3591_vm1, %v2966_v8  ;;  %s3480_s15 = smov 88   ;;  %s3482_s23 = smov 80  }
  0x32   : > { %2969 = vmatprep.subr.bf16.mxu0 %v3468_v2 }
  0x39   : > { %2972 = vmatpush1.bf16.xpose.msk.msra.mxu0 %vm3591_vm1, %v2970_v11 }
  0x3a   : > { %2973 = vmatprep.subr.bf16.mxu0 %v3468_v2 }
  0x41   : > { %2976 = vmatpush1.bf16.xpose.msk.msra.mxu0 %vm3591_vm1, %v2974_v14 }
  0x42   : > { %2977 = vmatprep.subr.bf16.mxu0 %v3468_v2 }
  0x49   : > { %2980 = vmatpush1.bf16.xpose.msk.msra.mxu0 %vm3591_vm1, %v2978_v17 }
  0x4a   : > { %2981 = vmatprep.subr.bf16.mxu0 %v3468_v2 }
  0x51   : > { %2984 = vmatpush1.bf16.xpose.msk.msra.mxu0 %vm3591_vm1, %v2982_v20 }
  0x52   : > { %2985 = vmatprep.subr.bf16.mxu0 %v3468_v2 }
  0x59   : > { %2988 = vmatpush1.bf16.xpose.msk.msra.mxu0 %vm3591_vm1, %v2986_v23 }
  0x5a   : > { %2989 = vmatprep.subr.bf16.mxu0 %v3468_v2 }
  0x61   : > { %2992 = vmatpush1.bf16.xpose.msk.msra.mxu0 %vm3591_vm1, %v2990_v26 }
  0x62   : > { %2993 = vmatprep.subr.bf16.mxu0 %v3468_v2 }
  0x69   : > { %2996 = vmatpush1.bf16.xpose.msk.msra.mxu0 %vm3591_vm1, %v2994_v29 }
  0x6a   : > { %2997 = vmatprep.subr.bf16.mxu0 %v3468_v2 }
  0x71   : > { %3000 = vmatpush1.bf16.xpose.msk.msra.mxu0 %vm3591_vm1, %v2998_v32 }
  0x72   : > { %3001 = vmatprep.subr.bf16.mxu0 %v3468_v2 }
  0x79   : > { %3004 = vmatpush1.bf16.xpose.msk.msra.mxu0 %vm3591_vm1, %v3002_v35 }
  0x7a   : > { %3005 = vmatprep.subr.bf16.mxu0 %v3468_v2 }
  0x81   : > { %3008 = vmatpush1.bf16.xpose.msk.msra.mxu0 %vm3591_vm1, %v3006_v38 }
  0x88   : > { %2681 = vmatmul.mubr.msk.f32.vlgmr.msra.gmra.mrb[0].mxu0 %vm263_vm0, %v237_v39 }
  0x89   : > { %412 = vmatprep.mubr.f32.mxu0 %v3469_v5 }
  0x8c   : > { %2682 = vmatmul.mubr.msk.f32.gmra.mrb[2].mxu0 %vm263_vm0, %v238_v40 }
 0x15b   : > { %v3694_v41 = vpop.f32.mrb[0].mxu0 }
 0x15c   : > { %v3698_v42 = vmul.f32 %v3694_v41, %v3694_v41  ;;  %v410_v43 = vpop.f32.mrb[1].mxu0 }
 0x15e   : > { %435 = vrot.lane.b32.xlu0 %v3698_v42, %s3470_s16  ;;  %v423_v49 = vsel %vm422_vm2, %v3698_v42, 0.0 }
 0x15f   : > { %v3702_v44 = vpop.f32.mrb[2].mxu0 }
 0x160   : > { %v3706_v45 = vmul.f32 %v3702_v44, %v3702_v44  ;;  %v416_v46 = vpop.f32.mrb[3].mxu0 }
 0x161   : > { %v3708_v47 = vpack.c.bf16 %v416_v46, %v410_v43  ;;  %v3710_v48 = vpack.i.bf16 %v416_v46, %v410_v43 }
 0x162   : > { %437 = vrot.lane.b32.xlu0 %v3706_v45, %s3470_s16  ;;  %v426_v54 = vsel %vm422_vm2, %v3706_v45, 0.0 }
 0x181   : > { %424 = vadd.xlane.f32.xlu0 %v423_v49 }
 0x197   : > { %656 = vrot.lane.b32.xlu0 %v3706_v45, %s3471_s17 }
 0x1d0   : > { %v436_v50 = vpop.permute.xlu0 %435 }
 0x1d1   : > { %v441_v51 = vsel %vm422_vm2, %v436_v50, 0.0 }
 0x1d2   : > { %442 = vadd.xlane.f32.xlu1 %v441_v51 }
 0x1d4   : > { %v438_v52 = vpop.permute.xlu0 %437 }
 0x1d5   : > { %v444_v53 = vsel %vm422_vm2, %v438_v52, 0.0 }
 0x1d6   : > { %445 = vadd.xlane.f32.xlu1 %v444_v53 }
 0x1da   : > { %427 = vadd.xlane.f32.xlu1 %v426_v54 }
 0x20e   : > { %v425_v55 = vpop.xlane.xlu0 %424 }
 0x20f   : > { %v429_v56 = vmax.f32 %v425_v55, 1e-24 }
 0x211   : > { %3256 = vrsqrt.f32 %v429_v56 }
 0x212   : > { %v657_v23 = vpop.permute.xlu0 %656 }
 0x213   : > { %v663_v24 = vsel %vm422_vm2, %v657_v23, 0.0 }
 0x21b   : > { %v3257_v58 = vpop.eup %3256 }
 0x21c   : > { %v452_v59 = vmul.f32 %v3257_v58, %v451_v57 }
 0x21e   : > { %v454_v60 = vmul.f32 %v452_v59, %v3694_v41 }
 0x220   : > { %2834 = vmatprep.mubr.msk.f32.mxu1 %vm422_vm2, %v454_v60 }
 0x25f   : > { %v443_v61 = vpop.xlane.xlu1 %442 }
 0x260   : > { %v447_v62 = vmax.f32 %v443_v61, 1e-24 }
 0x262   : > { %3258 = vrsqrt.f32 %v447_v62 }
 0x263   : > { %v446_v63 = vpop.xlane.xlu1 %445 }
 0x264   : > { %v448_v0 = vmax.f32 %v446_v63, 1e-24 }
 0x266   : > { %3260 = vrsqrt.f32 %v448_v0 }
 0x267   : > { %v428_v7 = vpop.xlane.xlu1 %427 }
 0x268   : > { %v430_v8 = vmax.f32 %v428_v7, 1e-24 }
 0x26a   : > { %3262 = vrsqrt.f32 %v430_v8 }
 0x26c   : > { %v3259_v1 = vpop.eup %3258 }
 0x26d   : > { %v456_v3 = vmul.f32 %v3259_v1, %v3694_v41 }
 0x270   : > { %v3261_v2 = vpop.eup %3260 }
 0x271   : > { %v457_v5 = vmul.f32 %v3261_v2, %v3702_v44 }
 0x273   : > { %v3181_v6 = vpack.i.bf16 %v457_v5, %v456_v3 }
 0x274   : > { %v3263_v14 = vpop.eup %3262 }
 0x275   : > { %3182 = vrot.lane.b32.xlu1 %v3181_v6, %s3470_s16  ;;  %v453_v17 = vmul.f32 %v3263_v14, %v451_v57  ;;  %s2717_s16 = sld [smem:[#allocation2 + $0x5]] }
 0x277   : > { %v455_v20 = vmul.f32 %v453_v17, %v3702_v44 }
 0x279   : > { %670 = vrot.lane.b32.xlu1 %v3698_v42, %s3472_s25 }
 0x27d   : > { %672 = vrot.lane.b32.xlu1 %v3706_v45, %s3472_s25 }
 0x281   : > { %654 = vrot.lane.b32.xlu1 %v3698_v42, %s3471_s17 }
 0x2e7   : > { %v3183_v9 = vpop.permute.xlu1 %3182 }
 0x2e8   : > { %v3185_v10 = vunpack.i.h.bf16 %v3183_v9  ;;  %v3184_v11 = vunpack.i.l.bf16 %v3183_v9 }
 0x2ea   : > { %v3009_v13 = vpack.c.bf16 %v3185_v10, %v3184_v11 }
 0x2eb   : > { %v671_v15 = vpop.permute.xlu1 %670 }
 0x2ec   : > { %3011 = vmatprep.subr.msk.bf16.mxu1 %vm3738_vm3, %v3009_v13  ;;  %v676_v16 = vsel %vm422_vm2, %v671_v15, 0.0 }
 0x2ed   : > { %677 = vadd.xlane.f32.xlu1 %v676_v16  ;;  %3014 = vmatpush3.bf16.xpose.msk.msra.mxu1 %vm3738_vm3, %v3009_v13 }
 0x2ee   : > { %3016 = vmatprep.subr.bf16.mxu1 %v3708_v47 }
 0x2ef   : > { %v673_v18 = vpop.permute.xlu1 %672 }
 0x2f0   : > { %v679_v19 = vsel %vm422_vm2, %v673_v18, 0.0 }
 0x2f1   : > { %680 = vadd.xlane.f32.xlu0 %v679_v19 }
 0x2f3   : > { %v655_v21 = vpop.permute.xlu1 %654 }
 0x2f4   : > { %2835 = vmatmul.mubr.msk.f32.vlgmr.msra.gmra.mrb[0].mxu1 %vm422_vm2, %v455_v20  ;;  %v660_v22 = vsel %vm422_vm2, %v655_v21, 0.0 }
 0x2f5   : > { %661 = vadd.xlane.f32.xlu1 %v660_v22  ;;  %3018 = vmatpush3.bf16.msra.mxu1 %v3708_v47  ;;  %v686_v47 = vstv %s2689_s6  ;;  %s3483_s6 = smov 8  }
 0x2f9   : > { %664 = vadd.xlane.f32.xlu1 %v663_v24 }
 0x37a   : > { %v678_v25 = vpop.xlane.xlu1 %677 }
 0x37b   : > { %v682_v26 = vmax.f32 %v678_v25, 1e-24 }
 0x37d   : > { %3264 = vrsqrt.f32 %v682_v26 }
 0x37e   : > { %v681_v27 = vpop.xlane.xlu0 %680 }
 0x37f   : > { %v683_v28 = vmax.f32 %v681_v27, 1e-24 }
 0x381   : > { %3266 = vrsqrt.f32 %v683_v28 }
 0x382   : > { %v662_v34 = vpop.xlane.xlu1 %661 }
 0x383   : > { %v666_v35 = vmax.f32 %v662_v34, 1e-24 }
 0x385   : > { %3268 = vrsqrt.f32 %v666_v35 }
 0x386   : > { %v665_v37 = vpop.xlane.xlu1 %664 }
 0x387   : > { %v3265_v29 = vpop.eup %3264  ;;  %v667_v40 = vmax.f32 %v665_v37, 1e-24 }
 0x388   : > { %v691_v31 = vmul.f32 %v3265_v29, %v3694_v41 }
 0x389   : > { %3270 = vrsqrt.f32 %v667_v40 }
 0x38b   : > { %v3267_v30 = vpop.eup %3266 }
 0x38c   : > { %v692_v32 = vmul.f32 %v3267_v30, %v3702_v44 }
 0x38e   : > { %v3186_v33 = vpack.i.bf16 %v692_v32, %v691_v31 }
 0x38f   : > { %v3269_v46 = vpop.eup %3268 }
 0x390   : > { %3187 = vrot.lane.b32.xlu0 %v3186_v33, %s3472_s25  ;;  %v687_v49 = vmul.f32 %v3269_v46, %v686_v47 }
 0x392   : > { %v689_v51 = vmul.f32 %v687_v49, %v3694_v41 }
 0x393   : > { %v3271_v50 = vpop.eup %3270 }
 0x394   : > { %916 = vrot.lane.b32.xlu0 %v3698_v42, %s3473_s26  ;;  %v688_v52 = vmul.f32 %v3271_v50, %v686_v47 }
 0x396   : > { %v690_v53 = vmul.f32 %v688_v52, %v3702_v44 }
 0x398   : > { %900 = vrot.lane.b32.xlu0 %v3698_v42, %s3474_s30 }
 0x3c7   : > { %v2836_v36 = vpop.f32.mrb[0].mxu1 }
 0x3c8   : > { %v540_v38 = vpop.f32.mrb[1].mxu1  ;;  %v553_v39 = vsel %vm549_vm4, %v2836_v36, -inf }
 0x3c9   : > { %554 = vmax.xlane.f32.xlu1 %v553_v39  ;;  %v550_v43 = vsel %vm549_vm4, %v540_v38, -inf }
 0x3cd   : > { %551 = vmax.xlane.f32.xlu1 %v550_v43 }
 0x3de   : > { %695 = vrot.lane.b32.xlu1 %v689_v51, %s3471_s17 }
 0x3e2   : > { %697 = vrot.lane.b32.xlu1 %v690_v53, %s3471_s17 }
 0x3e6   : > { %918 = vrot.lane.b32.xlu1 %v3706_v45, %s3473_s26 }
 0x3ea   : > { %902 = vrot.lane.b32.xlu1 %v3706_v45, %s3474_s30 }
 0x402   : > { %v3188_v54 = vpop.permute.xlu0 %3187 }
 0x403   : > { %v3190_v55 = vunpack.i.h.bf16 %v3188_v54  ;;  %v3189_v56 = vunpack.i.l.bf16 %v3188_v54 }
 0x405   : > { %v3019_v57 = vpack.c.bf16 %v3190_v55, %v3189_v56 }
 0x406   : > { %v917_v58 = vpop.permute.xlu0 %916 }
 0x407   : > { %3021 = vmatprep.subr.msk.bf16.mxu1 %vm3738_vm3, %v3019_v57  ;;  %v922_v59 = vsel %vm422_vm2, %v917_v58, 0.0 }
 0x408   : > { %923 = vadd.xlane.f32.xlu0 %v922_v59 }
 0x40a   : > { %v901_v60 = vpop.permute.xlu0 %900 }
 0x40b   : > { %v906_v61 = vsel %vm422_vm2, %v901_v60, 0.0 }
 0x40c   : > { %907 = vadd.xlane.f32.xlu0 %v906_v61 }
 0x456   : > { %v555_v62 = vpop.xlane.xlu1 %554 }
 0x457   : > { %v557_v63 = vsub.f32 %v2836_v36, %v555_v62 }
 0x459   : > { %v560_v2 = vmul.f32 1.442695, %v557_v63 }
 0x45a   : > { %v552_v0 = vpop.xlane.xlu1 %551 }
 0x45b   : > { %v556_v1 = vsub.f32 %v540_v38, %v552_v0  ;;  %v932_v38 = vstv %s2696_s7  ;;  %s3484_s7 = smov 72  }
 0x45d   : > { %v558_v3 = vmul.f32 1.442695, %v556_v1 }
 0x45e   : > { %v696_v5 = vpop.permute.xlu1 %695 }
 0x45f   : > { %3272 = vpow2.f32 %v558_v3 }
 0x460   : > { %3274 = vpow2.f32 %v560_v2 }
 0x462   : > { %v698_v6 = vpop.permute.xlu1 %697 }
 0x466   : > { %v919_v7 = vpop.permute.xlu1 %918 }
 0x467   : > { %v925_v8 = vsel %vm422_vm2, %v919_v7, 0.0 }
 0x468   : > { %926 = vadd.xlane.f32.xlu1 %v925_v8 }
 0x469   : > { %v3776_v9 = vpop.eup %3272 }
 0x46a   : > { %v3778_v10 = vpop.eup %3274  ;;  %2841 = vmatprep.mubr.msk.f32.mxu1 %vm549_vm4, %v3776_v9  ;;  %v903_v11 = vpop.permute.xlu1 %902  ;;  %v562_v12 = vsel %vm549_vm4, %v3776_v9, 0.0 }
 0x46b   : > { %2842 = vmatmul.mubr.msk.f32.vlgmr.msra.gmra.mrb[2].mxu1 %vm549_vm4, %v3778_v10  ;;  %v909_v13 = vsel %vm422_vm2, %v903_v11, 0.0 }
 0x46c   : > { %3024 = vmatpush3.bf16.xpose.msk.msra.mxu1 %vm3738_vm3, %v3019_v57  ;;  %910 = vadd.xlane.f32.xlu0 %v909_v13 }
 0x46d   : > { %2848 = vmatprep.mubr.msk.f32.mxu1 %vm422_vm2, %v696_v5 }
 0x473   : > { %2849 = vmatmul.mubr.msk.f32.vlgmr.msra.gmra.mrb[4].mxu1 %vm422_vm2, %v698_v6 }
 0x479   : > { %3192 = vrot.lane.b32.xlu1 %v3710_v48, %s3471_s17  ;;  %s3481_s17 = smov 16  }
 0x495   : > { %v924_v14 = vpop.xlane.xlu0 %923 }
 0x496   : > { %v928_v15 = vmax.f32 %v924_v14, 1e-24 }
 0x498   : > { %3276 = vrsqrt.f32 %v928_v15 }
 0x499   : > { %v908_v29 = vpop.xlane.xlu0 %907 }
 0x49a   : > { %v912_v30 = vmax.f32 %v908_v29, 1e-24 }
 0x4a2   : > { %v3277_v22 = vpop.eup %3276 }
 0x4a3   : > { %v937_v24 = vmul.f32 %v3277_v22, %v3694_v41 }
 0x4f5   : > { %v927_v16 = vpop.xlane.xlu1 %926 }
 0x4f6   : > { %v929_v17 = vmax.f32 %v927_v16, 1e-24 }
 0x4f8   : > { %3278 = vrsqrt.f32 %v929_v17 }
 0x4f9   : > { %v3193_v18 = vpop.permute.xlu1 %3192  ;;  %v911_v31 = vpop.xlane.xlu0 %910  ;;  %3280 = vrsqrt.f32 %v912_v30 }
 0x4fa   : > { %v3195_v19 = vunpack.i.h.bf16 %v3193_v18  ;;  %v3194_v20 = vunpack.i.l.bf16 %v3193_v18  ;;  %v913_v33 = vmax.f32 %v911_v31, 1e-24 }
 0x4fc   : > { %v3025_v21 = vpack.c.bf16 %v3195_v19, %v3194_v20  ;;  %3282 = vrsqrt.f32 %v913_v33 }
 0x4fe   : > { %3026 = vmatprep.subr.bf16.mxu1 %v3025_v21 }
 0x4ff   : > { %3028 = vmatpush3.bf16.msra.mxu1 %v3025_v21 }
 0x502   : > { %v3279_v23 = vpop.eup %3278 }
 0x503   : > { %v938_v25 = vmul.f32 %v3279_v23, %v3702_v44  ;;  %v3281_v37 = vpop.eup %3280 }
 0x504   : > { %v933_v39 = vmul.f32 %v3281_v37, %v932_v38  ;;  %v1176_v37 = vstv %s2703_s10 }
 0x505   : > { %v3196_v26 = vpack.i.bf16 %v938_v25, %v937_v24 }
 0x506   : > { %v3283_v40 = vpop.eup %3282  ;;  %v935_v43 = vmul.f32 %v933_v39, %v3694_v41 }
 0x507   : > { %v934_v46 = vmul.f32 %v3283_v40, %v932_v38 }
 0x509   : > { %v936_v47 = vmul.f32 %v934_v46, %v3702_v44 }
 0x53e   : > { %v3793_v27 = vpop.f32.mrb[2].mxu1 }
 0x53f   : > { %v3795_v28 = vpop.f32.mrb[3].mxu1 }
 0x546   : > { %v2850_v32 = vpop.f32.mrb[4].mxu1 }
 0x547   : > { %v779_v34 = vpop.f32.mrb[5].mxu1  ;;  %v791_v35 = vsel %vm549_vm4, %v2850_v32, -inf }
 0x548   : > { %792 = vmax.xlane.f32.xlu0 %v791_v35  ;;  %v788_v36 = vsel %vm549_vm4, %v779_v34, -inf }
 0x549   : > { %789 = vmax.xlane.f32.xlu1 %v788_v36 }
 0x55a   : > { %941 = vrot.lane.b32.xlu1 %v935_v43, %s3474_s30 }
 0x55e   : > { %3197 = vrot.lane.b32.xlu0 %v3196_v26, %s3473_s26  ;;  %943 = vrot.lane.b32.xlu1 %v936_v47, %s3474_s30 }
 0x562   : > { %1160 = vrot.lane.b32.xlu0 %v3698_v42, %s3475_s8  ;;  %1162 = vrot.lane.b32.xlu1 %v3706_v45, %s3475_s8 }
 0x566   : > { %1144 = vrot.lane.b32.xlu0 %v3698_v42, %s3476_s9  ;;  %1146 = vrot.lane.b32.xlu1 %v3706_v45, %s3476_s9 }
 0x5d5   : > { %v793_v49 = vpop.xlane.xlu0 %792 }
 0x5d6   : > { %v795_v50 = vsub.f32 %v2850_v32, %v793_v49  ;;  %v790_v51 = vpop.xlane.xlu1 %789 }
 0x5d7   : > { %v794_v52 = vsub.f32 %v779_v34, %v790_v51 }
 0x5d8   : > { %v798_v53 = vmul.f32 1.442695, %v795_v50 }
 0x5d9   : > { %v796_v54 = vmul.f32 1.442695, %v794_v52  ;;  %v3198_v55 = vpop.permute.xlu0 %3197 }
 0x5da   : > { %v3200_v56 = vunpack.i.h.bf16 %v3198_v55  ;;  %v3199_v57 = vunpack.i.l.bf16 %v3198_v55  ;;  %v942_v58 = vpop.permute.xlu1 %941 }
 0x5db   : > { %3284 = vpow2.f32 %v796_v54 }
 0x5dc   : > { %3286 = vpow2.f32 %v798_v53  ;;  %v3029_v59 = vpack.c.bf16 %v3200_v56, %v3199_v57 }
 0x5dd   : > { %v1161_v60 = vpop.permute.xlu0 %1160 }
 0x5de   : > { %3031 = vmatprep.subr.msk.bf16.mxu1 %vm3738_vm3, %v3029_v59  ;;  %v944_v61 = vpop.permute.xlu1 %943  ;;  %v1166_v62 = vsel %vm422_vm2, %v1161_v60, 0.0 }
 0x5df   : > { %1167 = vadd.xlane.f32.xlu0 %v1166_v62 }
 0x5e1   : > { %v1145_v63 = vpop.permute.xlu0 %1144 }
 0x5e2   : > { %v1163_v0 = vpop.permute.xlu1 %1162  ;;  %v1150_v1 = vsel %vm422_vm2, %v1145_v63, 0.0 }
 0x5e3   : > { %1151 = vadd.xlane.f32.xlu0 %v1150_v1  ;;  %v1169_v2 = vsel %vm422_vm2, %v1163_v0, 0.0 }
 0x5e4   : > { %1170 = vadd.xlane.f32.xlu1 %v1169_v2 }
 0x5e5   : > { %v3817_v3 = vpop.eup %3284 }
 0x5e6   : > { %v3819_v5 = vpop.eup %3286  ;;  %2855 = vmatprep.mubr.msk.f32.mxu1 %vm549_vm4, %v3817_v3  ;;  %v1147_v6 = vpop.permute.xlu1 %1146 }
 0x5e7   : > { %2856 = vmatmul.mubr.msk.f32.vlgmr.msra.gmra.mrb[6].mxu1 %vm549_vm4, %v3819_v5  ;;  %v1153_v7 = vsel %vm422_vm2, %v1147_v6, 0.0 }
 0x5e8   : > { %3034 = vmatpush3.bf16.xpose.msk.msra.mxu1 %vm3738_vm3, %v3029_v59  ;;  %2862 = vmatprep.mubr.msk.f32.mxu1 %vm422_vm2, %v942_v58 }
 0x5e9   : > { %1154 = vadd.xlane.f32.xlu0 %v1153_v7 }
 0x5ef   : > { %2863 = vmatmul.mubr.msk.f32.vlgmr.msra.gmra.mrb[8].mxu1 %vm422_vm2, %v944_v61 }
 0x5f5   : > { %3202 = vrot.lane.b32.xlu1 %v3710_v48, %s3474_s30  ;;  %s2724_s30 = sld [smem:[#allocation2 + $0x6]] }
 0x66c   : > { %v1168_v8 = vpop.xlane.xlu0 %1167 }
 0x66d   : > { %v1172_v11 = vmax.f32 %v1168_v8, 1e-24 }
 0x66f   : > { %3288 = vrsqrt.f32 %v1172_v11 }
 0x670   : > { %v1152_v24 = vpop.xlane.xlu0 %1151 }
 0x671   : > { %v1171_v13 = vpop.xlane.xlu1 %1170  ;;  %v1156_v29 = vmax.f32 %v1152_v24, 1e-24 }
 0x672   : > { %v1173_v14 = vmax.f32 %v1171_v13, 1e-24 }
 0x674   : > { %3290 = vrsqrt.f32 %v1173_v14 }
 0x675   : > { %v3203_v15 = vpop.permute.xlu1 %3202  ;;  %3292 = vrsqrt.f32 %v1156_v29 }
 0x676   : > { %v3205_v16 = vunpack.i.h.bf16 %v3203_v15  ;;  %v3204_v17 = vunpack.i.l.bf16 %v3203_v15  ;;  %v1155_v30 = vpop.xlane.xlu0 %1154 }
 0x677   : > { %v1157_v32 = vmax.f32 %v1155_v30, 1e-24 }
 0x678   : > { %v3035_v18 = vpack.c.bf16 %v3205_v16, %v3204_v17 }
 0x679   : > { %v3289_v19 = vpop.eup %3288  ;;  %3294 = vrsqrt.f32 %v1157_v32 }
 0x67a   : > { %3036 = vmatprep.subr.bf16.mxu1 %v3035_v18  ;;  %v1181_v21 = vmul.f32 %v3289_v19, %v3694_v41 }
 0x67b   : > { %3038 = vmatpush3.bf16.msra.mxu1 %v3035_v18 }
 0x67e   : > { %v3291_v20 = vpop.eup %3290 }
 0x67f   : > { %v1182_v22 = vmul.f32 %v3291_v20, %v3702_v44  ;;  %v3293_v36 = vpop.eup %3292 }
 0x680   : > { %v1177_v38 = vmul.f32 %v3293_v36, %v1176_v37 }
 0x681   : > { %v3206_v23 = vpack.i.bf16 %v1182_v22, %v1181_v21 }
 0x682   : > { %v1179_v40 = vmul.f32 %v1177_v38, %v3694_v41 }
 0x683   : > { %v3295_v39 = vpop.eup %3294 }
 0x684   : > { %v1178_v43 = vmul.f32 %v3295_v39, %v1176_v37 }
 0x686   : > { %v1180_v46 = vmul.f32 %v1178_v43, %v3702_v44 }
 0x6ba   : > { %v3834_v25 = vpop.f32.mrb[6].mxu1 }
 0x6bb   : > { %v3836_v26 = vpop.f32.mrb[7].mxu1 }
 0x6c2   : > { %v2864_v31 = vpop.f32.mrb[8].mxu1 }
 0x6c3   : > { %v1025_v33 = vpop.f32.mrb[9].mxu1  ;;  %v1037_v34 = vsel %vm549_vm4, %v2864_v31, -inf }
 0x6c4   : > { %1038 = vmax.xlane.f32.xlu0 %v1037_v34  ;;  %v1034_v35 = vsel %vm549_vm4, %v1025_v33, -inf }
 0x6c5   : > { %1035 = vmax.xlane.f32.xlu1 %v1034_v35 }
 0x6d6   : > { %1185 = vrot.lane.b32.xlu1 %v1179_v40, %s3476_s9  ;;  %v1420_v40 = vstv %s2710_s13 }
 0x6da   : > { %1187 = vrot.lane.b32.xlu1 %v1180_v46, %s3476_s9  ;;  %3207 = vrot.lane.b32.xlu0 %v3206_v23, %s3475_s8 }
 0x6de   : > { %1406 = vrot.lane.b32.xlu1 %v3706_v45, %s3477_s11  ;;  %1404 = vrot.lane.b32.xlu0 %v3698_v42, %s3477_s11 }
 0x6e2   : > { %1390 = vrot.lane.b32.xlu1 %v3706_v45, %s3478_s12  ;;  %1388 = vrot.lane.b32.xlu0 %v3698_v42, %s3478_s12 }
 0x751   : > { %v1039_v47 = vpop.xlane.xlu0 %1038 }
 0x752   : > { %v1041_v49 = vsub.f32 %v2864_v31, %v1039_v47  ;;  %v1036_v50 = vpop.xlane.xlu1 %1035 }
 0x753   : > { %v1040_v51 = vsub.f32 %v1025_v33, %v1036_v50 }
 0x754   : > { %v1044_v52 = vmul.f32 1.442695, %v1041_v49 }
 0x755   : > { %v1042_v53 = vmul.f32 1.442695, %v1040_v51  ;;  %v3208_v54 = vpop.permute.xlu0 %3207 }
 0x756   : > { %v3210_v55 = vunpack.i.h.bf16 %v3208_v54  ;;  %v3209_v56 = vunpack.i.l.bf16 %v3208_v54  ;;  %v1186_v57 = vpop.permute.xlu1 %1185 }
 0x757   : > { %3296 = vpow2.f32 %v1042_v53 }
 0x758   : > { %3298 = vpow2.f32 %v1044_v52  ;;  %v3039_v58 = vpack.c.bf16 %v3210_v55, %v3209_v56 }
 0x759   : > { %v1405_v59 = vpop.permute.xlu0 %1404 }
 0x75a   : > { %v1188_v60 = vpop.permute.xlu1 %1187  ;;  %3041 = vmatprep.subr.msk.bf16.mxu1 %vm3738_vm3, %v3039_v58  ;;  %v1410_v61 = vsel %vm422_vm2, %v1405_v59, 0.0 }
 0x75b   : > { %1411 = vadd.xlane.f32.xlu0 %v1410_v61 }
 0x75d   : > { %v1389_v62 = vpop.permute.xlu0 %1388 }
 0x75e   : > { %v1407_v63 = vpop.permute.xlu1 %1406  ;;  %v1394_v0 = vsel %vm422_vm2, %v1389_v62, 0.0 }
 0x75f   : > { %1395 = vadd.xlane.f32.xlu0 %v1394_v0  ;;  %v1413_v1 = vsel %vm422_vm2, %v1407_v63, 0.0 }
 0x760   : > { %1414 = vadd.xlane.f32.xlu1 %v1413_v1 }
 0x761   : > { %v3858_v2 = vpop.eup %3296 }
 0x762   : > { %v3860_v6 = vpop.eup %3298  ;;  %2869 = vmatprep.mubr.msk.f32.mxu1 %vm549_vm4, %v3858_v2  ;;  %v1391_v7 = vpop.permute.xlu1 %1390 }
 0x763   : > { %2870 = vmatmul.mubr.msk.f32.vlgmr.msra.gmra.mrb[10].mxu1 %vm549_vm4, %v3860_v6  ;;  %v1397_v8 = vsel %vm422_vm2, %v1391_v7, 0.0 }
 0x764   : > { %3044 = vmatpush3.bf16.xpose.msk.msra.mxu1 %vm3738_vm3, %v3039_v58  ;;  %1398 = vadd.xlane.f32.xlu0 %v1397_v8 }
 0x765   : > { %2876 = vmatprep.mubr.msk.f32.mxu1 %vm422_vm2, %v1186_v57 }
 0x76b   : > { %2877 = vmatmul.mubr.msk.f32.vlgmr.msra.gmra.mrb[12].mxu1 %vm422_vm2, %v1188_v60 }
 0x771   : > { %3212 = vrot.lane.b32.xlu1 %v3710_v48, %s3476_s9  ;;  %s2731_s9 = sld [smem:[#allocation2 + $0x7]] }
 0x7e8   : > { %v1412_v11 = vpop.xlane.xlu0 %1411 }
 0x7e9   : > { %v1416_v13 = vmax.f32 %v1412_v11, 1e-24 }
 0x7eb   : > { %3300 = vrsqrt.f32 %v1416_v13 }
 0x7ec   : > { %v1396_v29 = vpop.xlane.xlu0 %1395 }
 0x7ed   : > { %v1415_v14 = vpop.xlane.xlu1 %1414  ;;  %v1400_v32 = vmax.f32 %v1396_v29, 1e-24 }
 0x7ee   : > { %v1417_v15 = vmax.f32 %v1415_v14, 1e-24 }
 0x7f0   : > { %3302 = vrsqrt.f32 %v1417_v15 }
 0x7f1   : > { %v3213_v16 = vpop.permute.xlu1 %3212  ;;  %v1399_v33 = vpop.xlane.xlu0 %1398  ;;  %3304 = vrsqrt.f32 %v1400_v32 }
 0x7f2   : > { %v3215_v17 = vunpack.i.h.bf16 %v3213_v16  ;;  %v3214_v18 = vunpack.i.l.bf16 %v3213_v16  ;;  %v1401_v35 = vmax.f32 %v1399_v33, 1e-24 }
 0x7f4   : > { %v3045_v19 = vpack.c.bf16 %v3215_v17, %v3214_v18  ;;  %3306 = vrsqrt.f32 %v1401_v35 }
 0x7f5   : > { %v3301_v20 = vpop.eup %3300 }
 0x7f6   : > { %3046 = vmatprep.subr.bf16.mxu1 %v3045_v19  ;;  %v1425_v22 = vmul.f32 %v3301_v20, %v3694_v41 }
 0x7f7   : > { %3048 = vmatpush3.bf16.msra.mxu1 %v3045_v19 }
 0x7fa   : > { %v3303_v21 = vpop.eup %3302 }
 0x7fb   : > { %v1426_v23 = vmul.f32 %v3303_v21, %v3702_v44  ;;  %v3305_v39 = vpop.eup %3304 }
 0x7fc   : > { %v1421_v43 = vmul.f32 %v3305_v39, %v1420_v40 }
 0x7fd   : > { %v3216_v24 = vpack.i.bf16 %v1426_v23, %v1425_v22 }
 0x7fe   : > { %v3307_v46 = vpop.eup %3306  ;;  %v1423_v47 = vmul.f32 %v1421_v43, %v3694_v41 }
 0x7ff   : > { %v1422_v49 = vmul.f32 %v3307_v46, %v1420_v40 }
 0x801   : > { %v1424_v50 = vmul.f32 %v1422_v49, %v3702_v44 }
 0x836   : > { %v3875_v30 = vpop.f32.mrb[10].mxu1 }
 0x837   : > { %v3877_v31 = vpop.f32.mrb[11].mxu1 }
 0x83e   : > { %v2878_v34 = vpop.f32.mrb[12].mxu1 }
 0x83f   : > { %v1269_v36 = vpop.f32.mrb[13].mxu1  ;;  %v1281_v37 = vsel %vm549_vm4, %v2878_v34, -inf }
 0x840   : > { %1282 = vmax.xlane.f32.xlu0 %v1281_v37  ;;  %v1278_v38 = vsel %vm549_vm4, %v1269_v36, -inf }
 0x841   : > { %1279 = vmax.xlane.f32.xlu1 %v1278_v38 }
 0x852   : > { %1429 = vrot.lane.b32.xlu1 %v1423_v47, %s3478_s12 }
 0x856   : > { %3217 = vrot.lane.b32.xlu0 %v3216_v24, %s3477_s11  ;;  %1431 = vrot.lane.b32.xlu1 %v1424_v50, %s3478_s12 }
 0x85a   : > { %1648 = vrot.lane.b32.xlu0 %v3698_v42, %s3479_s14  ;;  %1650 = vrot.lane.b32.xlu1 %v3706_v45, %s3479_s14 }
 0x85e   : > { %1632 = vrot.lane.b32.xlu0 %v3698_v42, %s3480_s15  ;;  %1634 = vrot.lane.b32.xlu1 %v3706_v45, %s3480_s15 }
 0x8cd   : > { %v1283_v51 = vpop.xlane.xlu0 %1282 }
 0x8ce   : > { %v1285_v52 = vsub.f32 %v2878_v34, %v1283_v51  ;;  %v1280_v53 = vpop.xlane.xlu1 %1279 }
 0x8cf   : > { %v1284_v54 = vsub.f32 %v1269_v36, %v1280_v53 }
 0x8d0   : > { %v1288_v55 = vmul.f32 1.442695, %v1285_v52  ;;  %v1664_v52 = vstv %s2717_s16 }
 0x8d1   : > { %v1286_v56 = vmul.f32 1.442695, %v1284_v54  ;;  %v3218_v57 = vpop.permute.xlu0 %3217 }
 0x8d2   : > { %v3220_v58 = vunpack.i.h.bf16 %v3218_v57  ;;  %v3219_v59 = vunpack.i.l.bf16 %v3218_v57  ;;  %v1430_v60 = vpop.permute.xlu1 %1429 }
 0x8d3   : > { %3308 = vpow2.f32 %v1286_v56 }
 0x8d4   : > { %3310 = vpow2.f32 %v1288_v55  ;;  %v3049_v61 = vpack.c.bf16 %v3220_v58, %v3219_v59 }
 0x8d5   : > { %v1649_v62 = vpop.permute.xlu0 %1648 }
 0x8d6   : > { %3051 = vmatprep.subr.msk.bf16.mxu1 %vm3738_vm3, %v3049_v61  ;;  %v1432_v63 = vpop.permute.xlu1 %1431  ;;  %v1654_v0 = vsel %vm422_vm2, %v1649_v62, 0.0 }
 0x8d7   : > { %1655 = vadd.xlane.f32.xlu0 %v1654_v0 }
 0x8d9   : > { %v1633_v1 = vpop.permute.xlu0 %1632 }
 0x8da   : > { %v1651_v7 = vpop.permute.xlu1 %1650  ;;  %v1638_v8 = vsel %vm422_vm2, %v1633_v1, 0.0 }
 0x8db   : > { %1639 = vadd.xlane.f32.xlu0 %v1638_v8  ;;  %v1657_v11 = vsel %vm422_vm2, %v1651_v7, 0.0 }
 0x8dc   : > { %1658 = vadd.xlane.f32.xlu1 %v1657_v11 }
 0x8dd   : > { %v3899_v13 = vpop.eup %3308 }
 0x8de   : > { %v3901_v14 = vpop.eup %3310  ;;  %2883 = vmatprep.mubr.msk.f32.mxu1 %vm549_vm4, %v3899_v13  ;;  %v1635_v15 = vpop.permute.xlu1 %1634  ;;  %v1290_v9 = vsel %vm549_vm4, %v3899_v13, 0.0 }
 0x8df   : > { %2884 = vmatmul.mubr.msk.f32.vlgmr.msra.gmra.mrb[14].mxu1 %vm549_vm4, %v3901_v14  ;;  %v1641_v16 = vsel %vm422_vm2, %v1635_v15, 0.0 }
 0x8e0   : > { %3054 = vmatpush3.bf16.xpose.msk.msra.mxu1 %vm3738_vm3, %v3049_v61  ;;  %2890 = vmatprep.mubr.msk.f32.mxu1 %vm422_vm2, %v1430_v60 }
 0x8e1   : > { %1642 = vadd.xlane.f32.xlu0 %v1641_v16 }
 0x8e7   : > { %2891 = vmatmul.mubr.msk.f32.vlgmr.msra.gmra.mrb[16].mxu1 %vm422_vm2, %v1432_v63 }
 0x8ed   : > { %3222 = vrot.lane.b32.xlu1 %v3710_v48, %s3478_s12 }
 0x964   : > { %v1656_v17 = vpop.xlane.xlu0 %1655 }
 0x965   : > { %v1660_v18 = vmax.f32 %v1656_v17, 1e-24 }
 0x967   : > { %3312 = vrsqrt.f32 %v1660_v18 }
 0x968   : > { %v1640_v36 = vpop.xlane.xlu0 %1639 }
 0x969   : > { %v1659_v19 = vpop.xlane.xlu1 %1658  ;;  %v1644_v39 = vmax.f32 %v1640_v36, 1e-24 }
 0x96a   : > { %v1661_v20 = vmax.f32 %v1659_v19, 1e-24 }
 0x96c   : > { %3314 = vrsqrt.f32 %v1661_v20 }
 0x96d   : > { %v3223_v21 = vpop.permute.xlu1 %3222  ;;  %3316 = vrsqrt.f32 %v1644_v39 }
 0x96e   : > { %v3225_v22 = vunpack.i.h.bf16 %v3223_v21  ;;  %v3224_v23 = vunpack.i.l.bf16 %v3223_v21  ;;  %v1643_v40 = vpop.xlane.xlu0 %1642 }
 0x96f   : > { %v1645_v46 = vmax.f32 %v1643_v40, 1e-24 }
 0x970   : > { %v3055_v24 = vpack.c.bf16 %v3225_v22, %v3224_v23 }
 0x971   : > { %v3313_v29 = vpop.eup %3312  ;;  %3318 = vrsqrt.f32 %v1645_v46 }
 0x972   : > { %3056 = vmatprep.subr.bf16.mxu1 %v3055_v24  ;;  %v1669_v33 = vmul.f32 %v3313_v29, %v3694_v41 }
 0x973   : > { %3058 = vmatpush3.bf16.msra.mxu1 %v3055_v24 }
 0x976   : > { %v3315_v32 = vpop.eup %3314 }
 0x977   : > { %v1670_v34 = vmul.f32 %v3315_v32, %v3702_v44  ;;  %v3317_v51 = vpop.eup %3316 }
 0x978   : > { %v1665_v53 = vmul.f32 %v3317_v51, %v1664_v52 }
 0x979   : > { %v3226_v35 = vpack.i.bf16 %v1670_v34, %v1669_v33 }
 0x97a   : > { %v1667_v55 = vmul.f32 %v1665_v53, %v3694_v41 }
 0x97b   : > { %v3319_v54 = vpop.eup %3318 }
 0x97c   : > { %v1666_v56 = vmul.f32 %v3319_v54, %v1664_v52 }
 0x97e   : > { %v1668_v57 = vmul.f32 %v1666_v56, %v3702_v44 }
 0x9b2   : > { %v3916_v37 = vpop.f32.mrb[14].mxu1 }
 0x9b3   : > { %v3918_v38 = vpop.f32.mrb[15].mxu1 }
 0x9ba   : > { %v2892_v43 = vpop.f32.mrb[16].mxu1 }
 0x9bb   : > { %v1513_v47 = vpop.f32.mrb[17].mxu1  ;;  %v1525_v49 = vsel %vm549_vm4, %v2892_v43, -inf }
 0x9bc   : > { %1526 = vmax.xlane.f32.xlu0 %v1525_v49  ;;  %v1522_v50 = vsel %vm549_vm4, %v1513_v47, -inf }
 0x9bd   : > { %1523 = vmax.xlane.f32.xlu1 %v1522_v50 }
 0x9ce   : > { %1673 = vrot.lane.b32.xlu1 %v1667_v55, %s3480_s15 }
 0x9d2   : > { %1675 = vrot.lane.b32.xlu1 %v1668_v57, %s3480_s15  ;;  %3227 = vrot.lane.b32.xlu0 %v3226_v35, %s3479_s14 }
 0x9d6   : > { %1894 = vrot.lane.b32.xlu1 %v3706_v45, %s3481_s17  ;;  %1892 = vrot.lane.b32.xlu0 %v3698_v42, %s3481_s17 }
 0x9da   : > { %1878 = vrot.lane.b32.xlu1 %v3706_v45, %s3482_s23  ;;  %1876 = vrot.lane.b32.xlu0 %v3698_v42, %s3482_s23 }
 0xa49   : > { %v1527_v58 = vpop.xlane.xlu0 %1526 }
 0xa4a   : > { %v1529_v59 = vsub.f32 %v2892_v43, %v1527_v58  ;;  %v1524_v60 = vpop.xlane.xlu1 %1523 }
 0xa4b   : > { %v1528_v61 = vsub.f32 %v1513_v47, %v1524_v60 }
 0xa4c   : > { %v1532_v62 = vmul.f32 1.442695, %v1529_v59 }
 0xa4d   : > { %v1530_v63 = vmul.f32 1.442695, %v1528_v61  ;;  %v3228_v0 = vpop.permute.xlu0 %3227 }
 0xa4e   : > { %v3230_v1 = vunpack.i.h.bf16 %v3228_v0  ;;  %v3229_v7 = vunpack.i.l.bf16 %v3228_v0  ;;  %v1674_v8 = vpop.permute.xlu1 %1673 }
 0xa4f   : > { %3320 = vpow2.f32 %v1530_v63  ;;  %v1908_v63 = vstv %s2724_s30 }
 0xa50   : > { %3322 = vpow2.f32 %v1532_v62  ;;  %v3059_v11 = vpack.c.bf16 %v3230_v1, %v3229_v7 }
 0xa51   : > { %v1893_v15 = vpop.permute.xlu0 %1892 }
 0xa52   : > { %v1676_v16 = vpop.permute.xlu1 %1675  ;;  %3061 = vmatprep.subr.msk.bf16.mxu1 %vm3738_vm3, %v3059_v11  ;;  %v1898_v17 = vsel %vm422_vm2, %v1893_v15, 0.0 }
 0xa53   : > { %1899 = vadd.xlane.f32.xlu0 %v1898_v17 }
 0xa55   : > { %v1877_v18 = vpop.permute.xlu0 %1876 }
 0xa56   : > { %v1895_v19 = vpop.permute.xlu1 %1894  ;;  %v1882_v20 = vsel %vm422_vm2, %v1877_v18, 0.0 }
 0xa57   : > { %1883 = vadd.xlane.f32.xlu0 %v1882_v20  ;;  %v1901_v21 = vsel %vm422_vm2, %v1895_v19, 0.0 }
 0xa58   : > { %1902 = vadd.xlane.f32.xlu1 %v1901_v21 }
 0xa59   : > { %v3940_v22 = vpop.eup %3320 }
 0xa5a   : > { %v3942_v23 = vpop.eup %3322  ;;  %2897 = vmatprep.mubr.msk.f32.mxu1 %vm549_vm4, %v3940_v22  ;;  %v1879_v24 = vpop.permute.xlu1 %1878 }
 0xa5b   : > { %2898 = vmatmul.mubr.msk.f32.vlgmr.msra.gmra.mrb[18].mxu1 %vm549_vm4, %v3942_v23  ;;  %v1885_v29 = vsel %vm422_vm2, %v1879_v24, 0.0 }
 0xa5c   : > { %3064 = vmatpush3.bf16.xpose.msk.msra.mxu1 %vm3738_vm3, %v3059_v11  ;;  %1886 = vadd.xlane.f32.xlu0 %v1885_v29 }
 0xa5d   : > { %2904 = vmatprep.mubr.msk.f32.mxu1 %vm422_vm2, %v1674_v8 }
 0xa63   : > { %2905 = vmatmul.mubr.msk.f32.vlgmr.msra.gmra.mrb[20].mxu1 %vm422_vm2, %v1676_v16 }
 0xa69   : > { %3232 = vrot.lane.b32.xlu1 %v3710_v48, %s3480_s15 }
 0xae0   : > { %v1900_v32 = vpop.xlane.xlu0 %1899 }
 0xae1   : > { %v1904_v33 = vmax.f32 %v1900_v32, 1e-24 }
 0xae3   : > { %3324 = vrsqrt.f32 %v1904_v33 }
 0xae4   : > { %v1884_v52 = vpop.xlane.xlu0 %1883 }
 0xae5   : > { %v1903_v34 = vpop.xlane.xlu1 %1902  ;;  %v1888_v55 = vmax.f32 %v1884_v52, 1e-24 }
 0xae6   : > { %v1905_v35 = vmax.f32 %v1903_v34, 1e-24 }
 0xae8   : > { %3326 = vrsqrt.f32 %v1905_v35 }
 0xae9   : > { %v3233_v36 = vpop.permute.xlu1 %3232  ;;  %v1887_v56 = vpop.xlane.xlu0 %1886  ;;  %3328 = vrsqrt.f32 %v1888_v55 }
 0xaea   : > { %v3235_v39 = vunpack.i.h.bf16 %v3233_v36  ;;  %v3234_v40 = vunpack.i.l.bf16 %v3233_v36  ;;  %v1889_v58 = vmax.f32 %v1887_v56, 1e-24 }
 0xaec   : > { %v3065_v43 = vpack.c.bf16 %v3235_v39, %v3234_v40  ;;  %3330 = vrsqrt.f32 %v1889_v58 }
 0xaed   : > { %v3325_v46 = vpop.eup %3324 }
 0xaee   : > { %3066 = vmatprep.subr.bf16.mxu1 %v3065_v43  ;;  %v1913_v49 = vmul.f32 %v3325_v46, %v3694_v41 }
 0xaef   : > { %3068 = vmatpush3.bf16.msra.mxu1 %v3065_v43 }
 0xaf2   : > { %v3327_v47 = vpop.eup %3326 }
 0xaf3   : > { %v1914_v50 = vmul.f32 %v3327_v47, %v3702_v44  ;;  %v3329_v62 = vpop.eup %3328 }
 0xaf4   : > { %v1909_v0 = vmul.f32 %v3329_v62, %v1908_v63 }
 0xaf5   : > { %v3236_v51 = vpack.i.bf16 %v1914_v50, %v1913_v49 }
 0xaf6   : > { %v3331_v1 = vpop.eup %3330  ;;  %v1911_v7 = vmul.f32 %v1909_v0, %v3694_v41 }
 0xaf7   : > { %v1910_v8 = vmul.f32 %v3331_v1, %v1908_v63 }
 0xaf9   : > { %v1912_v11 = vmul.f32 %v1910_v8, %v3702_v44 }
 0xb2e   : > { %v3957_v53 = vpop.f32.mrb[18].mxu1 }
 0xb2f   : > { %v3959_v54 = vpop.f32.mrb[19].mxu1 }
 0xb36   : > { %v2906_v57 = vpop.f32.mrb[20].mxu1 }
 0xb37   : > { %v1757_v59 = vpop.f32.mrb[21].mxu1  ;;  %v1769_v60 = vsel %vm549_vm4, %v2906_v57, -inf }
 0xb38   : > { %1770 = vmax.xlane.f32.xlu0 %v1769_v60  ;;  %v1766_v61 = vsel %vm549_vm4, %v1757_v59, -inf }
 0xb39   : > { %1767 = vmax.xlane.f32.xlu1 %v1766_v61 }
 0xb4a   : > { %1917 = vrot.lane.b32.xlu1 %v1911_v7, %s3482_s23 }
 0xb4e   : > { %3237 = vrot.lane.b32.xlu0 %v3236_v51, %s3481_s17  ;;  %1919 = vrot.lane.b32.xlu1 %v1912_v11, %s3482_s23 }
 0xb52   : > { %2136 = vrot.lane.b32.xlu0 %v3698_v42, %s3483_s6  ;;  %2138 = vrot.lane.b32.xlu1 %v3706_v45, %s3483_s6 }
 0xb56   : > { %2120 = vrot.lane.b32.xlu0 %v3698_v42, %s3484_s7  ;;  %2122 = vrot.lane.b32.xlu1 %v3706_v45, %s3484_s7 }
 0xbc5   : > { %v1771_v15 = vpop.xlane.xlu0 %1770 }
 0xbc6   : > { %v1773_v16 = vsub.f32 %v2906_v57, %v1771_v15  ;;  %v1768_v17 = vpop.xlane.xlu1 %1767 }
 0xbc7   : > { %v1772_v18 = vsub.f32 %v1757_v59, %v1768_v17 }
 0xbc8   : > { %v1776_v19 = vmul.f32 1.442695, %v1773_v16 }
 0xbc9   : > { %v1774_v20 = vmul.f32 1.442695, %v1772_v18  ;;  %v3238_v21 = vpop.permute.xlu0 %3237 }
 0xbca   : > { %v3240_v24 = vunpack.i.h.bf16 %v3238_v21  ;;  %v3239_v29 = vunpack.i.l.bf16 %v3238_v21  ;;  %v1918_v32 = vpop.permute.xlu1 %1917 }
 0xbcb   : > { %3332 = vpow2.f32 %v1774_v20 }
 0xbcc   : > { %3334 = vpow2.f32 %v1776_v19  ;;  %v3069_v33 = vpack.c.bf16 %v3240_v24, %v3239_v29  ;;  %v2152_v24 = vstv %s2731_s9 }
 0xbcd   : > { %v2137_v34 = vpop.permute.xlu0 %2136 }
 0xbce   : > { %3071 = vmatprep.subr.msk.bf16.mxu1 %vm3738_vm3, %v3069_v33  ;;  %v1920_v42 = vpop.permute.xlu1 %1919  ;;  %v2142_v45 = vsel %vm422_vm2, %v2137_v34, 0.0 }
 0xbcf   : > { %2143 = vadd.xlane.f32.xlu0 %v2142_v45 }
 0xbd1   : > { %v2121_v35 = vpop.permute.xlu0 %2120 }
 0xbd2   : > { %v2139_v36 = vpop.permute.xlu1 %2138  ;;  %v2126_v39 = vsel %vm422_vm2, %v2121_v35, 0.0 }
 0xbd3   : > { %v2145_v40 = vsel %vm422_vm2, %v2139_v36, 0.0  ;;  %2127 = vadd.xlane.f32.xlu0 %v2126_v39 }
 0xbd4   : > { %2146 = vadd.xlane.f32.xlu1 %v2145_v40 }
 0xbd5   : > { %v3981_v43 = vpop.eup %3332 }
 0xbd6   : > { %v3983_v46 = vpop.eup %3334  ;;  %2911 = vmatprep.mubr.msk.f32.mxu1 %vm549_vm4, %v3981_v43  ;;  %v2123_v47 = vpop.permute.xlu1 %2122 }
 0xbd7   : > { %2912 = vmatmul.mubr.msk.f32.vlgmr.msra.gmra.mrb[22].mxu1 %vm549_vm4, %v3983_v46  ;;  %v2129_v49 = vsel %vm422_vm2, %v2123_v47, 0.0 }
 0xbd8   : > { %3074 = vmatpush3.bf16.xpose.msk.msra.mxu1 %vm3738_vm3, %v3069_v33  ;;  %2918 = vmatprep.mubr.msk.f32.mxu1 %vm422_vm2, %v1918_v32 }
 0xbd9   : > { %2130 = vadd.xlane.f32.xlu0 %v2129_v49 }
 0xbdf   : > { %2919 = vmatmul.mubr.msk.f32.vlgmr.msra.gmra.mrb[24].mxu1 %vm422_vm2, %v1920_v42 }
 0xbe5   : > { %3242 = vrot.lane.b32.xlu1 %v3710_v48, %s3482_s23 }
 0xc5c   : > { %v2144_v50 = vpop.xlane.xlu0 %2143 }
 0xc5d   : > { %v2148_v51 = vmax.f32 %v2144_v50, 1e-24 }
 0xc5f   : > { %3336 = vrsqrt.f32 %v2148_v51 }
 0xc60   : > { %v2128_v1 = vpop.xlane.xlu0 %2127 }
 0xc61   : > { %v2147_v52 = vpop.xlane.xlu1 %2146  ;;  %v2132_v11 = vmax.f32 %v2128_v1, 1e-24  ;;  %v803_v1 = vsel %vm549_vm4, %v3819_v5, 0.0  ;;  %v1537_v5 = vsel %vm549_vm4, %v3942_v23, 0.0 }
 0xc62   : > { %v2149_v55 = vmax.f32 %v2147_v52, 1e-24 }
 0xc64   : > { %3338 = vrsqrt.f32 %v2149_v55 }
 0xc65   : > { %v3243_v56 = vpop.permute.xlu1 %3242  ;;  %3340 = vrsqrt.f32 %v2132_v11  ;;  %v1046_v11 = vsel %vm549_vm4, %v3858_v2, 0.0  ;;  %v1778_v2 = vsel %vm549_vm4, %v3981_v43, 0.0 }
 0xc66   : > { %v3245_v57 = vunpack.i.h.bf16 %v3243_v56  ;;  %v3244_v58 = vunpack.i.l.bf16 %v3243_v56  ;;  %v2131_v15 = vpop.xlane.xlu0 %2130 }
 0xc67   : > { %v2133_v17 = vmax.f32 %v2131_v15, 1e-24 }
 0xc68   : > { %v3075_v59 = vpack.c.bf16 %v3245_v57, %v3244_v58 }
 0xc69   : > { %v3337_v60 = vpop.eup %3336  ;;  %3342 = vrsqrt.f32 %v2133_v17 }
 0xc6a   : > { %3076 = vmatprep.subr.bf16.mxu1 %v3075_v59  ;;  %v2157_v62 = vmul.f32 %v3337_v60, %v3694_v41 }
 0xc6b   : > { %3078 = vmatpush3.bf16.msra.mxu1 %v3075_v59 }
 0xc6e   : > { %v3339_v61 = vpop.eup %3338 }
 0xc6f   : > { %v2158_v63 = vmul.f32 %v3339_v61, %v3702_v44  ;;  %v3341_v21 = vpop.eup %3340 }
 0xc70   : > { %v2153_v29 = vmul.f32 %v3341_v21, %v2152_v24 }
 0xc71   : > { %v3246_v0 = vpack.i.bf16 %v2158_v63, %v2157_v62  ;;  %v565_v63 = vsel %vm549_vm4, %v3778_v10, 0.0  ;;  %v1293_v10 = vsel %vm549_vm4, %v3901_v14, 0.0  ;;  %v1049_v14 = vsel %vm549_vm4, %v3860_v6, 0.0 }
 0xc72   : > { %v2155_v33 = vmul.f32 %v2153_v29, %v3694_v41 }
 0xc73   : > { %v3343_v32 = vpop.eup %3342 }
 0xc74   : > { %v2154_v34 = vmul.f32 %v3343_v32, %v2152_v24 }
 0xc76   : > { %v2156_v42 = vmul.f32 %v2154_v34, %v3702_v44 }
 0xcaa   : > { %v3998_v7 = vpop.f32.mrb[22].mxu1 }
 0xcab   : > { %v4000_v8 = vpop.f32.mrb[23].mxu1 }
 0xcb2   : > { %v2920_v16 = vpop.f32.mrb[24].mxu1 }
 0xcb3   : > { %v2001_v18 = vpop.f32.mrb[25].mxu1  ;;  %v2013_v19 = vsel %vm549_vm4, %v2920_v16, -inf }
 0xcb4   : > { %2014 = vmax.xlane.f32.xlu0 %v2013_v19  ;;  %v2010_v20 = vsel %vm549_vm4, %v2001_v18, -inf }
 0xcb5   : > { %2011 = vmax.xlane.f32.xlu1 %v2010_v20 }
 0xcc6   : > { %2161 = vrot.lane.b32.xlu1 %v2155_v33, %s3484_s7 }
 0xcca   : > { %2163 = vrot.lane.b32.xlu1 %v2156_v42, %s3484_s7  ;;  %3247 = vrot.lane.b32.xlu0 %v3246_v0, %s3483_s6  ;;  %v800_v0 = vsel %vm549_vm4, %v3817_v3, 0.0  ;;  %v1534_v3 = vsel %vm549_vm4, %v3940_v22, 0.0 }
 0xd41   : > { %v2015_v45 = vpop.xlane.xlu0 %2014 }
 0xd42   : > { %v2017_v35 = vsub.f32 %v2920_v16, %v2015_v45  ;;  %v2012_v36 = vpop.xlane.xlu1 %2011 }
 0xd43   : > { %v2016_v39 = vsub.f32 %v2001_v18, %v2012_v36 }
 0xd44   : > { %v2020_v40 = vmul.f32 1.442695, %v2017_v35 }
 0xd45   : > { %v2018_v47 = vmul.f32 1.442695, %v2016_v39  ;;  %v3248_v49 = vpop.permute.xlu0 %3247 }
 0xd46   : > { %v3250_v50 = vunpack.i.h.bf16 %v3248_v49  ;;  %v3249_v51 = vunpack.i.l.bf16 %v3248_v49  ;;  %v2162_v55 = vpop.permute.xlu1 %2161 }
 0xd47   : > { %3344 = vpow2.f32 %v2018_v47 }
 0xd48   : > { %3346 = vpow2.f32 %v2020_v40  ;;  %v3079_v41 = vpack.c.bf16 %v3250_v50, %v3249_v51 }
 0xd4a   : > { %3081 = vmatprep.subr.msk.bf16.mxu1 %vm3738_vm3, %v3079_v41  ;;  %v2164_v56 = vpop.permute.xlu1 %2163 }
 0xd51   : > { %v3345_v44 = vpop.eup %3344 }
 0xd52   : > { %v3347_v52 = vpop.eup %3346  ;;  %2925 = vmatprep.mubr.msk.f32.mxu1 %vm549_vm4, %v3345_v44  ;;  %v2022_v13 = vsel %vm549_vm4, %v3345_v44, 0.0 }
 0xd53   : > { %2926 = vmatmul.mubr.msk.f32.vlgmr.msra.gmra.mrb[26].mxu1 %vm549_vm4, %v3347_v52  ;;  %v2025_v22 = vsel %vm549_vm4, %v3347_v52, 0.0 }
 0xd54   : > { %3084 = vmatpush3.bf16.xpose.msk.msra.mxu1 %vm3738_vm3, %v3079_v41  ;;  %2932 = vmatprep.mubr.msk.f32.mxu1 %vm422_vm2, %v2162_v55 }
 0xd5b   : > { %2933 = vmatmul.mubr.msk.f32.vlgmr.msra.gmra.mrb[28].mxu1 %vm422_vm2, %v2164_v56 }
 0xe26   : > { %v4017_v57 = vpop.f32.mrb[26].mxu1 }
 0xe27   : > { %v4019_v58 = vpop.f32.mrb[27].mxu1 }
 0xe2e   : > { %v2934_v59 = vpop.f32.mrb[28].mxu1 }
 0xe2f   : > { %v2245_v60 = vpop.f32.mrb[29].mxu1  ;;  %v2257_v61 = vsel %vm549_vm4, %v2934_v59, -inf }
 0xe30   : > { %2258 = vmax.xlane.f32.xlu1 %v2257_v61  ;;  %v2254_v62 = vsel %vm549_vm4, %v2245_v60, -inf }
 0xe31   : > { %2255 = vmax.xlane.f32.xlu0 %v2254_v62 }
 0xe34   : > { %563 = vadd.xlane.f32.xlu1 %v562_v12 }
 0xe38   : > { %566 = vadd.xlane.f32.xlu1 %v565_v63 }
 0xe3c   : > { %801 = vadd.xlane.f32.xlu1 %v800_v0 }
 0xe40   : > { %804 = vadd.xlane.f32.xlu1 %v803_v1 }
 0xe44   : > { %1047 = vadd.xlane.f32.xlu1 %v1046_v11 }
 0xe47   : > { %3252 = vrot.lane.b32.xlu0 %v3710_v48, %s3484_s7  ;;  %v1781_v48 = vsel %vm549_vm4, %v3983_v46, 0.0  ;;  %s3485_s7 = smov [#allocation5]  }
 0xe48   : > { %1291 = vadd.xlane.f32.xlu1 %v1290_v9  ;;  %s3403_s9 = sshll.u32 %s3485_s7, 4  ;;  %s3404_s9 = int_to_ptr.vmem [resolvable:$false] %s3403_s9 }
 0xe49   : > { %s3405_s10 = scalar_lea.vmem %s3404_s9, 512 }
 0xe4c   : > { %1294 = vadd.xlane.f32.xlu1 %v1293_v10 }
 0xe50   : > { %1535 = vadd.xlane.f32.xlu1 %v1534_v3 }
 0xe54   : > { %1538 = vadd.xlane.f32.xlu1 %v1537_v5 }
 0xe58   : > { %1779 = vadd.xlane.f32.xlu1 %v1778_v2 }
 0xe5c   : > { %1782 = vadd.xlane.f32.xlu1 %v1781_v48 }
 0xe60   : > { %2023 = vadd.xlane.f32.xlu1 %v2022_v13 }
 0xe66   : > { %1050 = vadd.xlane.f32.xlu0 %v1049_v14  ;;  %v2441_v14 = vld [vmem:[%s4194_s3 + $0x18] sm:$0xff] }
 0xe6a   : > { %2026 = vadd.xlane.f32.xlu0 %v2025_v22  ;;  %v2442_v22 = vld [vmem:[%s4194_s3 + $0x20] sm:$0xff] }
 0xebd   : > { %v2259_v23 = vpop.xlane.xlu1 %2258 }
 0xebe   : > { %v2261_v15 = vsub.f32 %v2934_v59, %v2259_v23  ;;  %v2256_v16 = vpop.xlane.xlu0 %2255  ;;  %v2443_v23 = vld [vmem:[%s4194_s3 + $0x28] sm:$0xff] }
 0xebf   : > { %v2260_v17 = vsub.f32 %v2245_v60, %v2256_v16  ;;  %v2444_v16 = vld [vmem:[%s4194_s3 + $0x30] sm:$0xff] }
 0xec0   : > { %v2264_v43 = vmul.f32 1.442695, %v2261_v15  ;;  %v3101_v15 = vpack.c.bf16 %v2443_v23, %v2442_v22 }
 0xec1   : > { %v2262_v18 = vmul.f32 1.442695, %v2260_v17  ;;  %v564_v19 = vpop.xlane.xlu1 %563  ;;  %v2445_v17 = vld [vmem:[%s4194_s3 + $0x38] sm:$0xff] }
 0xec2   : > { %3348 = vpow2.f32 %v2264_v43  ;;  %v3253_v46 = vpop.permute.xlu0 %3252  ;;  %v3107_v43 = vpack.c.bf16 %v2445_v17, %v2444_v16 }
 0xec3   : > { %3350 = vpow2.f32 %v2262_v18  ;;  %v3255_v20 = vunpack.i.h.bf16 %v3253_v46  ;;  %v3254_v21 = vunpack.i.l.bf16 %v3253_v46 }
 0xec4   : > { %3352 = vrcp.f32 %v564_v19 }
 0xec5   : > { %v3085_v24 = vpack.c.bf16 %v3255_v20, %v3254_v21  ;;  %v567_v29 = vpop.xlane.xlu1 %566 }
 0xec6   : > { %3354 = vrcp.f32 %v567_v29 }
 0xec7   : > { %3086 = vmatprep.subr.bf16.mxu1 %v3085_v24 }
 0xec8   : > { %3088 = vmatpush3.bf16.msra.mxu1 %v3085_v24 }
 0xec9   : > { %v802_v6 = vpop.xlane.xlu1 %801 }
 0xeca   : > { %3356 = vrcp.f32 %v802_v6 }
 0xecc   : > { %v3349_v32 = vpop.eup %3348 }
 0xecd   : > { %v3351_v33 = vpop.eup %3350  ;;  %v805_v34 = vpop.xlane.xlu1 %804  ;;  %v2269_v42 = vsel %vm549_vm4, %v3349_v32, 0.0 }
 0xece   : > { %v3353_v45 = vpop.eup %3352  ;;  %2270 = vadd.xlane.f32.xlu0 %v2269_v42  ;;  %2939 = vmatprep.mubr.msk.f32.mxu1 %vm549_vm4, %v3351_v33  ;;  %v2266_v35 = vsel %vm549_vm4, %v3351_v33, 0.0  ;;  %3358 = vrcp.f32 %v805_v34 }
 0xecf   : > { %2267 = vadd.xlane.f32.xlu1 %v2266_v35  ;;  %2940 = vmatmul.mubr.msk.f32.vlgmr.msra.gmra.mrb[30].mxu1 %vm549_vm4, %v3349_v32  ;;  %v4056_v36 = vmul.f32 %v3353_v45, %v3795_v28 }
 0xed0   : > { %v3355_v39 = vpop.eup %3354 }
 0xed1   : > { %v1048_v40 = vpop.xlane.xlu1 %1047  ;;  %v4059_v47 = vmul.f32 %v3355_v39, %v3793_v27 }
 0xed2   : > { %3360 = vrcp.f32 %v1048_v40 }
 0xed4   : > { %v3357_v51 = vpop.eup %3356 }
 0xed5   : > { %v1292_v49 = vpop.xlane.xlu1 %1291  ;;  %v897_v52 = vmul.f32 %v3357_v51, %v3836_v26 }
 0xed8   : > { %v3359_v44 = vpop.eup %3358 }
 0xed9   : > { %v1295_v50 = vpop.xlane.xlu1 %1294  ;;  %v898_v56 = vmul.f32 %v3359_v44, %v3834_v25 }
 0xeda   : > { %3362 = vrcp.f32 %v1295_v50 }
 0xedc   : > { %v3361_v55 = vpop.eup %3360 }
 0xedd   : > { %v1536_v41 = vpop.xlane.xlu1 %1535  ;;  %v1141_v27 = vmul.f32 %v3361_v55, %v3877_v31 }
 0xee0   : > { %2365 = vrot.lane.b32.xlu1 %v897_v52, %s3483_s6 }
 0xee1   : > { %v1539_v28 = vpop.xlane.xlu1 %1538 }
 0xee2   : > { %3364 = vrcp.f32 %v1539_v28 }
 0xee4   : > { %v3363_v59 = vpop.eup %3362  ;;  %2367 = vrot.lane.b32.xlu0 %v898_v56, %s3483_s6  ;;  %2373 = vrot.lane.b32.xlu1 %v1141_v27, %s3481_s17 }
 0xee5   : > { %v1780_v60 = vpop.xlane.xlu1 %1779  ;;  %v1386_v61 = vmul.f32 %v3363_v59, %v3916_v37 }
 0xee8   : > { %2383 = vrot.lane.b32.xlu0 %v1386_v61, %s3479_s14 }
 0xee9   : > { %v1783_v26 = vpop.xlane.xlu1 %1782 }
 0xeea   : > { %3366 = vrcp.f32 %v1783_v26 }
 0xeec   : > { %v3365_v62 = vpop.eup %3364 }
 0xeed   : > { %v1630_v12 = vmul.f32 %v3365_v62, %v3957_v53  ;;  %v2024_v1 = vpop.xlane.xlu1 %2023 }
 0xeef   : > { %2391 = vrot.lane.b32.xlu0 %v1630_v12, %s3477_s11 }
 0xef3   : > { %v1051_v25 = vpop.xlane.xlu0 %1050 }
 0xef4   : > { %v3367_v63 = vpop.eup %3366  ;;  %3368 = vrcp.f32 %v1051_v25 }
 0xef5   : > { %v1874_v31 = vmul.f32 %v3367_v63, %v3998_v7  ;;  %3370 = vrcp.f32 %v1292_v49  ;;  %v2738_v63 = vld [vmem:[%s4195_s4] ss:$0 sm:$0xff] }
 0xef7   : > { %2399 = vrot.lane.b32.xlu0 %v1874_v31, %s3475_s8  ;;  %v2027_v0 = vpop.xlane.xlu0 %2026 }
 0xef8   : > { %3372 = vrcp.f32 %v2027_v0 }
 0xef9   : > { %3374 = vrcp.f32 %v1536_v41 }
 0xefa   : > { %3376 = vrcp.f32 %v1780_v60 }
 0xefb   : > { %3378 = vrcp.f32 %v2024_v1 }
 0xefe   : > { %v3369_v37 = vpop.eup %3368 }
 0xeff   : > { %v1142_v11 = vmul.f32 %v3369_v37, %v3875_v30  ;;  %v3371_v9 = vpop.eup %3370 }
 0xf00   : > { %v1385_v10 = vmul.f32 %v3371_v9, %v3918_v38  ;;  %v2438_v38 = vld [vmem:[%s4194_s3] sm:$0xff] }
 0xf01   : > { %2375 = vrot.lane.b32.xlu1 %v1142_v11, %s3481_s17  ;;  %s2755_s17 = sshll.u32 %s3538_s22, 8 }
 0xf02   : > { %v3373_v53 = vpop.eup %3372  ;;  %s4145_s23 = scalar_lea.hbm %s4196_s5, %s2755_s17 }
 0xf03   : > { %v2118_v7 = vmul.f32 %v3373_v53, %v4017_v57  ;;  %v3375_v3 = vpop.eup %3374  ;;  %v2440_v57 = vld [vmem:[%s4194_s3 + $0x10] sm:$0xff] }
 0xf04   : > { %v1629_v5 = vmul.f32 %v3375_v3, %v3959_v54  ;;  %v3377_v2 = vpop.eup %3376  ;;  %v2439_v54 = vld [vmem:[%s4194_s3 + $0x8] sm:$0xff] }
 0xf05   : > { %2381 = vrot.lane.b32.xlu1 %v1385_v10, %s3479_s14  ;;  %2407 = vrot.lane.b32.xlu0 %v2118_v7, %s3473_s26  ;;  %v1873_v30 = vmul.f32 %v3377_v2, %v4000_v8  ;;  %v3379_v48 = vpop.eup %3378  ;;  %v3089_v8 = vpack.c.bf16 %v2439_v54, %v2438_v38 }
 0xf06   : > { %v2117_v13 = vmul.f32 %v3379_v48, %v4019_v58  ;;  %v3095_v58 = vpack.c.bf16 %v2441_v14, %v2440_v57 }
 0xf07   : > { %3091 = vmatprep.subr.msk.bf16.mxu0 %vm3591_vm1, %v3089_v8 }
 0xf08   : > { %3094 = vmatpush3.bf16.xpose.msk.msra.mxu0 %vm3591_vm1, %v3089_v8 }
 0xf09   : > { %2389 = vrot.lane.b32.xlu1 %v1629_v5, %s3477_s11  ;;  %3097 = vmatprep.subr.msk.bf16.mxu0 %vm3591_vm1, %v3095_v58 }
 0xf0d   : > { %2397 = vrot.lane.b32.xlu1 %v1873_v30, %s3475_s8 }
 0xf10   : > { %3100 = vmatpush3.bf16.xpose.msk.msra.mxu0 %vm3591_vm1, %v3095_v58 }
 0xf11   : > { %2405 = vrot.lane.b32.xlu1 %v2117_v13, %s3473_s26  ;;  %3103 = vmatprep.subr.msk.bf16.mxu0 %vm3591_vm1, %v3101_v15 }
 0xf18   : > { %3106 = vmatpush3.bf16.xpose.msk.msra.mxu0 %vm3591_vm1, %v3101_v15 }
 0xf19   : > { %3109 = vmatprep.subr.msk.bf16.mxu0 %vm3591_vm1, %v3107_v43 }
 0xf20   : > { %3112 = vmatpush3.bf16.xpose.msk.msra.mxu0 %vm3591_vm1, %v3107_v43 }
 0xf5b   : > { %v2271_v18 = vpop.xlane.xlu0 %2270 }
 0xf5c   : > { %v2268_v19 = vpop.xlane.xlu1 %2267  ;;  %3380 = vrcp.f32 %v2271_v18 }
 0xf5d   : > { %3382 = vrcp.f32 %v2268_v19 }
 0xf5f   : > { %v2368_v42 = vpop.permute.xlu0 %2367 }
 0xf60   : > { %v2366_v32 = vpop.permute.xlu1 %2365  ;;  %v2420_v40 = vsel %vm422_vm2, %v4059_v47, %v2368_v42 }
 0xf61   : > { %v2419_v44 = vsel %vm422_vm2, %v4056_v36, %v2366_v32 }
 0xf63   : > { %v2384_v45 = vpop.permute.xlu0 %2383 }
 0xf64   : > { %v2374_v33 = vpop.permute.xlu1 %2373 }
 0xf65   : > { %v2421_v28 = vsel %vm549_vm4, %v2419_v44, %v2374_v33 }
 0xf66   : > { %v3381_v46 = vpop.eup %3380 }
 0xf67   : > { %v3383_v21 = vpop.eup %3382  ;;  %v2392_v39 = vpop.permute.xlu0 %2391 }
 0xf6b   : > { %v2400_v51 = vpop.permute.xlu0 %2399 }
 0xf73   : > { %v2376_v34 = vpop.permute.xlu1 %2375 }
 0xf74   : > { %v2422_v49 = vsel %vm549_vm4, %v2420_v40, %v2376_v34 }
 0xf75   : > { %v2425_v41 = vsel %vm2423_vm5, %v2422_v49, %v2384_v45 }
 0xf76   : > { %v2428_v52 = vsel %vm2426_vm6, %v2425_v41, %v2392_v39 }
 0xf77   : > { %v2382_v4 = vpop.permute.xlu1 %2381  ;;  %v2408_v55 = vpop.permute.xlu0 %2407  ;;  %v2431_v59 = vsel %vm2429_vm7, %v2428_v52, %v2400_v51 }
 0xf78   : > { %v2424_v27 = vsel %vm2423_vm5, %v2421_v28, %v2382_v4  ;;  %v2434_v12 = vsel %vm2432_vm8, %v2431_v59, %v2408_v55 }
 0xf7b   : > { %v2390_v35 = vpop.permute.xlu1 %2389 }
 0xf7c   : > { %v2427_v47 = vsel %vm2426_vm6, %v2424_v27, %v2390_v35 }
 0xf7f   : > { %v2398_v50 = vpop.permute.xlu1 %2397 }
 0xf80   : > { %v2430_v60 = vsel %vm2429_vm7, %v2427_v47, %v2398_v50 }
 0xf83   : > { %v2406_v56 = vpop.permute.xlu1 %2405 }
 0xf84   : > { %v2433_v26 = vsel %vm2432_vm8, %v2430_v60, %v2406_v56 }
 0xfa2   : > { %v2941_v20 = vpop.f32.mrb[30].mxu1 }
 0xfa3   : > { %v2362_v24 = vmul.f32 %v3381_v46, %v2941_v20  ;;  %v2350_v29 = vpop.f32.mrb[31].mxu1 }
 0xfa4   : > { %v2361_v6 = vmul.f32 %v3383_v21, %v2350_v29 }
 0xfa5   : > { %2415 = vrot.lane.b32.xlu0 %v2362_v24, %s3472_s25 }
 0xfa6   : > { %2413 = vrot.lane.b32.xlu1 %v2361_v6, %s3472_s25  ;;  %s229_s25 = sand.u32 1, %s3457_s19  }
 0xfa7   : > { %s2654_s13 = sshll.u32 %s229_s25, 4  ;;  %s4149_s30 = scalar_lea.sflag [#allocation3], %s229_s25 }
 0xfa8   : > { %s231_s16 = scalar_lea.vmem [#allocation5], %s2654_s13 }
 0xfa9   : > { %s2574_s11 = sshll.u32 %s231_s16, 4  ;;  %s4140_s11 = int_to_ptr.vmem [resolvable:$true] %s2574_s11 }
 0xfaa   : > { %s3399_s22 = scalar_lea.vmem %s4140_s11, 256  ;;  %p3406_p13 = scmp.lt.s32.totalorder %s4140_s11, %s3404_s9 }
 0xfab   : > { %p3400_p10 = scmp.ne.s32.totalorder %s4140_s11, %s3399_s22  ;;  %p3407_p0 = scmp.lt.s32.totalorder %s3405_s10, %s3399_s22 }
 0xfad   : > { %p3401_p11 = pnand %p3400_p10, %p3555_p5  ;;  %p3408_p1 = por %p3407_p0, %p3406_p13 }
 0xfaf   : > { %p3402_p12 = pneg %p3401_p11 }
 0xfb1   : > { %p3409_p2 = pnand %p3408_p1, %p3402_p12 }
0x1017   : > { %v2416_v61 = vpop.permute.xlu0 %2415 }
0x1018   : > { %v2414_v62 = vpop.permute.xlu1 %2413  ;;  %v2437_v36 = vsel %vm2435_vm9, %v2434_v12, %v2416_v61 }
0x1019   : > { %v2436_v25 = vsel %vm2435_vm9, %v2433_v26, %v2414_v62 }
0x101a   : > { %2958 = vmatprep.mubr.msk.f32.mxu0 %vm263_vm0, %v2436_v25 }
0x101b   : > { %2959 = vmatmul.mubr.msk.f32.vlgmr.msra.gmra.mrb[4].mxu0 %vm263_vm0, %v2437_v36 }
0x10ee   : > { %v2960_v31 = vpop.f32.mrb[4].mxu0 }
0x10ef   : > { %v2555_v0 = vadd.f32 %v2960_v31, %v2738_v63  ;;  %v2549_v37 = vpop.f32.mrb[5].mxu0 }
0x10f0   : > { %v2550_v1 = vadd.f32 %v2738_v63, %v2549_v37 }
0x10f1   : > { %2559 = vst.msk [vmem:[%s231_s16 + $0x8] sm:$0xff] %vm263_vm0, %v2555_v0 }
0x10f2   : > { %2558 = vst.msk [vmem:[%s231_s16] sm:$0xff] %vm263_vm0, %v2550_v1 }
0x10f3   : > { %3412 = shalt.err (!%p3409_p2)
}
0x10f4   : > { %s3413_s12 = scalar_lea.hbm %s4145_s23, 256  ;;  %s3417_s14 = scalar_lea.hbm %s4196_s5, 512 }
0x10f5   : > { %p3414_p3 = scmp.ne.s32.totalorder %s4145_s23, %s3413_s12  ;;  %p3418_p8 = scmp.lt.u32.totalorder %s4145_s23, %s4196_s5 }
0x10f6   : > { %p3419_p9 = scmp.lt.u32.totalorder %s3417_s14, %s3413_s12  ;;  %p3421_p11 = scmp.lt.u32.totalorder %s3413_s12, %s4145_s23 }
0x10f7   : > { %p3415_p4 = pnand %p3414_p3, %p3555_p5 }
0x10f8   : > { %p3420_p10 = por %p3419_p9, %p3418_p8 }
0x10f9   : > { %p3416_p7 = pneg %p3415_p4 }
0x10fa   : > { %p3422_p12 = por %p3421_p11, %p3420_p10 }
0x10fc   : > { %p3423_p13 = pnand %p3422_p12, %p3416_p7 }
0x10fe   : > { %3426 = shalt.err (!%p3423_p13)
}
0x10ff   : > { %s3486_s17 = smov 128  }
0x1100   : > { %3117 = dma.vmem_to_hbm [thread:$0]  (%p3555_p5), %s4140_s11, 256, %s4145_s23, %s4149_s30, %s3486_s17, %s3486_s17, %s3483_s6  }
0x1101 PF: > { %p3129_p0 = scmp.ge.s32.totalorder %s3465_s21, 2  ;;  %s2589_s26 = sand.u32 1, %s3453_s18  }
0x1102   : > { %s2590_s8 = scalar_lea.sflag [#allocation3], %s2589_s26 }
0x1103   : > { %p3124_p1 = pnand %p3129_p0, %p3559_p6 }
0x1105   : > { %3448 = dma.done.wait (!%p3124_p1), %s2590_s8, 256  }
0x1106   : > { %3450 = vsyncadd (!%p3124_p1), %s2590_s8, 4294967040  ;;  %p16_p2 = scmp.ge.s32.totalorder %s3542_s24, 4   ;;  %s4204_s18 = smov %s3457_s19 }
0x1107   : > { %s4205_s19 = smov %s3461_s20  ;;  %s4206_s20 = smov %s3553_s27 }
0x1108   : > { %s4207_s21 = smov %s3542_s24  ;;  %18 = sbr.rel (!%p16_p2) target bundleno = 4 (0x4), region = 80 }
0x110f   :  { %2595 = vsyncpa [#allocation3], 1 }
0x1110   :  { %2597 = vsyncpa [#allocation3 + $0x1], 1 }
0x1111   :  { %2598 = vsyncpa [#allocation4], 1 }
0x1112   :  { %2600 = vsyncpa [#allocation4 + $0x1], 1 }

</bundles_post_ra>
